<compile_context>
chip_gen: v6e
topology: v6e:2x2x1
jax: 0.10.0
libtpu: 0.0.40
codegen_flags: <defaults>
</compile_context>

<pallas_src>
import jax
import jax.numpy as jnp
from jax.experimental import pallas as pl
from jax.experimental.pallas import tpu as pltpu


def _make_kernel(num_layers, tn, act_dtype):
    def kernel(*refs):
        x_ref = refs[0]
        w_refs = refs[1:1 + num_layers]
        t_refs = refs[1 + num_layers:1 + 2 * num_layers]
        out_ref = refs[1 + 2 * num_layers]
        acc_ref = refs[2 + 2 * num_layers]

        nt = pl.program_id(1)

        @pl.when(nt == 0)
        def _():
            acc_ref[...] = jnp.full_like(acc_ref, -jnp.inf)

        # MLP stack at true per-layer shapes (no Cmax padding, no channel concat).
        h = x_ref[0]                                        # [Cin_pad, TN] (f32 or bf16)
        for i in range(num_layers):
            w = w_refs[i][...]                              # [Cout_i, Cin_i], BN-scale folded
            z = jnp.dot(w, h, preferred_element_type=jnp.float32)
            a = jnp.maximum(z + t_refs[i][...], 0.0)        # conv-bias + BN shift, ReLU (f32)
            h = a.astype(act_dtype) if i + 1 < num_layers else a

        # Running max kept lane-wide: pure VPU maxes over 128-lane slices of h;
        # the cross-lane reduce happens only once per batch, in the epilogue.
        m = acc_ref[...]                                    # [Cout_last, 128] f32
        n_full = tn // 128
        for j in range(n_full):
            m = jnp.maximum(m, h[:, j * 128:(j + 1) * 128])
        if tn % 128:                                        # ragged full-N fallback tile
            m = jnp.maximum(m, jnp.max(h[:, n_full * 128:], axis=-1, keepdims=True))
        acc_ref[...] = m

        @pl.when(nt == pl.num_programs(1) - 1)
        def _():
            out_ref[...] = jnp.max(acc_ref[...], axis=-1)[None, None, :]

    return kernel


def _const_index_map(ndim):
    return lambda b, n: (0,) * ndim


def _pick_tile_n(n, cmax, want=None, vmem_budget_bytes=16 << 20):
    """N tile: lane-aligned, divides N, sized from a per-step VMEM budget."""
    if want is None:
        # ~6 live f32 [cmax, TN]-ish temporaries per step (h, z, relu, casts,
        # double-buffered x stream) dominate per-step VMEM.
        per_col = 6 * 4 * max(int(cmax), 8)
        want = (vmem_budget_bytes // per_col) // 256 * 256   # multiple of 256 (MXU out dim)
        want = max(256, min(2048, want))
    if n % 128 != 0:
        # Single full-N tile fallback.  NOTE: zero-padding N instead is NOT
        # safe without masking (a zero point column gives relu(shift) != 0 and
        # would corrupt the channel max).
        return n
    tn = max(128, min((int(want) // 128) * 128, n))
    while n % tn != 0:
        tn -= 128
    return tn


def pointnet_sa_group_all(xyz, points, params, *, tile_n=None, mxu_bf16=False,
                          vmem_budget_bytes=16 << 20):
    """Forward of PointNetSetAbstraction with group_all=True.

    xyz:    [B, 3, N] float32   (PyTorch layout: B, C, N)
    points: [B, D, N] float32 or None
    params: list of (W [Cin, Cout], scale [Cout], shift [Cout]) per MLP layer
            (scale/shift = Conv2d bias + BatchNorm2d eval stats, pre-folded)
    Returns:
        new_xyz    [B, 3, 1]          (zeros, like sample_and_group_all)
        new_points [B, Cout_last, 1]  (matches torch output [B, D', S], S=1)
    """
    B, C, N = xyz.shape
    feats = xyz if points is None else jnp.concatenate([xyz, points], axis=1)
    feats = feats.astype(jnp.float32)
    cin = feats.shape[1]
    L = len(params)
    couts = [int(w.shape[1]) for (w, _, _) in params]
    cout_last = couts[-1]

    x_dtype = jnp.bfloat16 if mxu_bf16 else jnp.float32
    sub = 16 if mxu_bf16 else 8                      # sublane packing of x_dtype
    cin_pad = -(-cin // sub) * sub
    if cin_pad > cin:                                # align the streamed x DMA; the padded
        feats = jnp.concatenate(                     # channels hit zero weight columns so
            [feats, jnp.zeros((B, cin_pad - cin, N), jnp.float32)], axis=1)  # they add 0
    feats = feats.astype(x_dtype)

    # Fold the BN scale into the weights in f32, transpose to [Cout, Cin], pad
    # only layer 0's input (K) dim with zero columns, THEN cast (bf16 path).
    # Each layer keeps its true shape — no [Cmax, Cmax] packing.
    ws, ts = [], []
    for i, (w, s, t) in enumerate(params):
        wt = (w.astype(jnp.float32) * s.astype(jnp.float32)[None, :]).T      # [Cout_i, Cin_i]
        if i == 0 and cin_pad > cin:
            wt = jnp.pad(wt, ((0, 0), (0, cin_pad - cin)))
        ws.append(wt.astype(x_dtype))
        ts.append(t.astype(jnp.float32).reshape(-1, 1))                      # [Cout_i, 1]

    cmax = max([cin_pad] + couts)
    tn = _pick_tile_n(N, cmax, tile_n, vmem_budget_bytes)
    grid = (B, N // tn)

    isz = jnp.dtype(x_dtype).itemsize
    est = (2 * cin_pad * tn * isz                             # x double buffer
           + 2 * sum(int(w.size) for w in ws) * isz           # weights (<= 2 buffers)
           + 2 * sum(int(t.size) for t in ts) * 4             # shifts
           + 3 * cmax * tn * 4                                # matmul/ReLU temporaries
           + cout_last * 128 * 4)                             # running-max scratch
    vmem_limit = int(min(64 << 20, max(32 << 20, 2 * est)))

    kernel = _make_kernel(L, tn, x_dtype)

    def build(single_buffer_consts):
        def const_spec(arr):
            if single_buffer_consts:
                # Constant index map -> double-buffering buys nothing; single-buffer.
                return pl.BlockSpec(arr.shape, _const_index_map(arr.ndim),
                                    pipeline_mode=pl.Buffered(1))
            return pl.BlockSpec(arr.shape, _const_index_map(arr.ndim))

        return pl.pallas_call(
            kernel,
            out_shape=jax.ShapeDtypeStruct((B, 1, cout_last), jnp.float32),
            grid_spec=pltpu.PrefetchScalarGridSpec(
                num_scalar_prefetch=0,
                grid=grid,
                in_specs=([pl.BlockSpec((1, cin_pad, tn), lambda b, n: (b, 0, n))]
                          + [const_spec(w) for w in ws]
                          + [const_spec(t) for t in ts]),
                out_specs=pl.BlockSpec((1, 1, cout_last), lambda b, n: (b, 0, 0)),
                scratch_shapes=[pltpu.VMEM((cout_last, 128), jnp.float32)],
            ),
            compiler_params=pltpu.CompilerParams(
                dimension_semantics=("parallel", "arbitrary"),
                vmem_limit_bytes=vmem_limit),
        )

    try:
        out = build(True)(feats, *ws, *ts)
    except Exception:
        # Fallback if this JAX version rejects single-buffered constant blocks.
        out = build(False)(feats, *ws, *ts)

    new_points = jnp.transpose(out, (0, 2, 1))               # lane-dense out -> [B, Cout, 1]
    new_xyz = jnp.zeros((B, C, 1), jnp.float32)              # centroid at origin
    return new_xyz, new_points


def _reference(xyz, points, params):
    """Plain-JAX reference of the same forward pass (for correctness check)."""
    h = jnp.concatenate(
        [jnp.transpose(xyz, (0, 2, 1)), jnp.transpose(points, (0, 2, 1))], axis=-1
    )                                                        # [B, N, Cin]
    for (w, s, t) in params:
        h = jnp.maximum(jnp.einsum("bnc,cd->bnd", h, w) * s + t, 0.0)
    return jnp.max(h, axis=1)[:, :, None]                    # [B, Cout_last, 1]


if __name__ == "__main__":
    key = jax.random.PRNGKey(0)
    B, D, N = 2, 4, 1024          # batch, feature channels, number of points
    in_channel = 3 + D            # xyz coords concatenated with features
    mlp = [16, 32, 64]
    eps = 1e-5

    key, kx, kp = jax.random.split(key, 3)
    xyz = jax.random.normal(kx, (B, 3, N), jnp.float32)
    points = jax.random.normal(kp, (B, D, N), jnp.float32)

    # Deterministic parameters: Conv2d(1x1) weight+bias and BatchNorm2d
    # (gamma, beta, running_mean, running_var) folded into scale/shift.
    params = []
    last = in_channel
    for li, co in enumerate(mlp):
        key, kw = jax.random.split(key)
        w = jax.random.normal(kw, (last, co), jnp.float32) * 0.1
        b_conv = 0.01 * jnp.arange(co, dtype=jnp.float32)
        gamma = 1.0 + 0.05 * jnp.arange(co, dtype=jnp.float32) / co
        beta = 0.02 * jnp.arange(co, dtype=jnp.float32)
        r_mean = 0.03 * jnp.arange(co, dtype=jnp.float32)
        r_var = 1.0 + 0.1 * jnp.arange(co, dtype=jnp.float32) / co
        s_bn = gamma / jnp.sqrt(r_var + eps)
        scale = s_bn
        shift = (b_conv - r_mean) * s_bn + beta
        params.append((w, scale, shift))
        last = co

    ref = _reference(xyz, points, params)

    # f32 path, VMEM-budget-derived tile (single full-N tile at these shapes).
    new_xyz, new_points = pointnet_sa_group_all(xyz, points, params)
    jax.block_until_ready(new_points)
    assert new_xyz.shape == (B, 3, 1)
    assert new_points.shape == (B, mlp[-1], 1)
    assert jnp.allclose(new_points, ref, atol=1e-5, rtol=1e-5)

    # f32 path, explicit small tile to exercise the multi-tile running max.
    _, np_tiled = pointnet_sa_group_all(xyz, points, params, tile_n=256)
    jax.block_until_ready(np_tiled)
    assert jnp.allclose(np_tiled, ref, atol=1e-5, rtol=1e-5)

    # bf16-at-the-MXU path (valid on v5e/v6e/v7x; elementwise math stays f32).
    _, np_bf16 = pointnet_sa_group_all(xyz, points, params, tile_n=512, mxu_bf16=True)
    jax.block_until_ready(np_bf16)
    assert jnp.allclose(np_bf16, ref, atol=5e-2, rtol=5e-2)

    print("KERNEL_OK")
</pallas_src>

<mosaic_0001>
module attributes {stable_mosaic.version = 11 : i64} {
  func.func @kernel(%arg0: i32, %arg1: i32, %arg2: memref<1x8x1024xf32, #tpu.memory_space<vmem>>, %arg3: memref<16x8xf32, #tpu.memory_space<vmem>>, %arg4: memref<32x16xf32, #tpu.memory_space<vmem>>, %arg5: memref<64x32xf32, #tpu.memory_space<vmem>>, %arg6: memref<16x1xf32, #tpu.memory_space<vmem>>, %arg7: memref<32x1xf32, #tpu.memory_space<vmem>>, %arg8: memref<64x1xf32, #tpu.memory_space<vmem>>, %arg9: memref<1x1x64xf32, #tpu.memory_space<vmem>>, %arg10: memref<64x128xf32, #tpu.memory_space<vmem>>) attributes {dimension_semantics = [#tpu.dimension_semantics<parallel>, #tpu.dimension_semantics<arbitrary>], iteration_bounds = array<i64: 2, 1>, scalar_prefetch = 0 : i64, scratch_operands = 1 : i64, tpu.core_type = #tpu.core_type<tc>, window_params = [{transform_indices = @transform_0, window_bounds = array<i64: 1, 8, 1024>}, {pipeline_mode = #tpu.pipeline_mode<synchronous>, transform_indices = @transform_1, window_bounds = array<i64: 16, 8>}, {pipeline_mode = #tpu.pipeline_mode<synchronous>, transform_indices = @transform_2, window_bounds = array<i64: 32, 16>}, {pipeline_mode = #tpu.pipeline_mode<synchronous>, transform_indices = @transform_3, window_bounds = array<i64: 64, 32>}, {pipeline_mode = #tpu.pipeline_mode<synchronous>, transform_indices = @transform_4, window_bounds = array<i64: 16, 1>}, {pipeline_mode = #tpu.pipeline_mode<synchronous>, transform_indices = @transform_5, window_bounds = array<i64: 32, 1>}, {pipeline_mode = #tpu.pipeline_mode<synchronous>, transform_indices = @transform_6, window_bounds = array<i64: 64, 1>}, {transform_indices = @transform_7, window_bounds = array<i64: 1, 1, 64>}]} {
    %c0_i32 = arith.constant 0 : i32
    %0 = arith.cmpi eq, %arg1, %c0_i32 : i32
    %1 = arith.extui %0 : i1 to i32
    %c0_i32_0 = arith.constant 0 : i32
    %2 = arith.cmpi ne, %1, %c0_i32_0 : i32
    scf.if %2 {
      %cst_26 = arith.constant 0xFF800000 : f32
      %47 = vector.broadcast %cst_26 : f32 to vector<64x128xf32>
      %c0_27 = arith.constant 0 : index
      %c0_28 = arith.constant 0 : index
      %48 = vector.load %arg10[%c0_27, %c0_28] : memref<64x128xf32, #tpu.memory_space<vmem>>, vector<64x128xf32>
      tpu.vector_store %arg10[%c0_27, %c0_28], %47 {strides = array<i32>} : memref<64x128xf32, #tpu.memory_space<vmem>>, vector<64x128xf32>,
    } else {
    }
    %c0 = arith.constant 0 : index
    %c0_1 = arith.constant 0 : index
    %c0_2 = arith.constant 0 : index
    %3 = vector.load %arg2[%c0, %c0_1, %c0_2] : memref<1x8x1024xf32, #tpu.memory_space<vmem>>, vector<1x8x1024xf32>
    %4 = vector.shape_cast %3 : vector<1x8x1024xf32> to vector<8x1024xf32>
    %c0_3 = arith.constant 0 : index
    %c0_4 = arith.constant 0 : index
    %5 = vector.load %arg3[%c0_3, %c0_4] : memref<16x8xf32, #tpu.memory_space<vmem>>, vector<16x8xf32>
    %cst = arith.constant dense<0.000000e+00> : vector<16x1024xf32>
    %6 = tpu.matmul %5, %4, %cst {dimension_numbers = #tpu.dot_dimension_numbers<[1], [0], [0], [1], [0, 0, 1, 1], [], []>} : vector<16x8xf32>, vector<8x1024xf32>, vector<16x1024xf32> -> vector<16x1024xf32>
    %c0_5 = arith.constant 0 : index
    %c0_6 = arith.constant 0 : index
    %7 = vector.load %arg6[%c0_5, %c0_6] : memref<16x1xf32, #tpu.memory_space<vmem>>, vector<16x1xf32>
    %8 = vector.broadcast %7 : vector<16x1xf32> to vector<16x1024xf32>
    %9 = arith.addf %6, %8 : vector<16x1024xf32>
    %cst_7 = arith.constant 0.000000e+00 : f32
    %10 = vector.broadcast %cst_7 : f32 to vector<16x1024xf32>
    %11 = arith.maximumf %9, %10 : vector<16x1024xf32>
    %c0_8 = arith.constant 0 : index
    %c0_9 = arith.constant 0 : index
    %12 = vector.load %arg4[%c0_8, %c0_9] : memref<32x16xf32, #tpu.memory_space<vmem>>, vector<32x16xf32>
    %cst_10 = arith.constant dense<0.000000e+00> : vector<32x1024xf32>
    %13 = tpu.matmul %12, %11, %cst_10 {dimension_numbers = #tpu.dot_dimension_numbers<[1], [0], [0], [1], [0, 0, 1, 1], [], []>} : vector<32x16xf32>, vector<16x1024xf32>, vector<32x1024xf32> -> vector<32x1024xf32>
    %c0_11 = arith.constant 0 : index
    %c0_12 = arith.constant 0 : index
    %14 = vector.load %arg7[%c0_11, %c0_12] : memref<32x1xf32, #tpu.memory_space<vmem>>, vector<32x1xf32>
    %15 = vector.broadcast %14 : vector<32x1xf32> to vector<32x1024xf32>
    %16 = arith.addf %13, %15 : vector<32x1024xf32>
    %cst_13 = arith.constant 0.000000e+00 : f32
    %17 = vector.broadcast %cst_13 : f32 to vector<32x1024xf32>
    %18 = arith.maximumf %16, %17 : vector<32x1024xf32>
    %c0_14 = arith.constant 0 : index
    %c0_15 = arith.constant 0 : index
    %19 = vector.load %arg5[%c0_14, %c0_15] : memref<64x32xf32, #tpu.memory_space<vmem>>, vector<64x32xf32>
    %cst_16 = arith.constant dense<0.000000e+00> : vector<64x1024xf32>
    %20 = tpu.matmul %19, %18, %cst_16 {dimension_numbers = #tpu.dot_dimension_numbers<[1], [0], [0], [1], [0, 0, 1, 1], [], []>} : vector<64x32xf32>, vector<32x1024xf32>, vector<64x1024xf32> -> vector<64x1024xf32>
    %c0_17 = arith.constant 0 : index
    %c0_18 = arith.constant 0 : index
    %21 = vector.load %arg8[%c0_17, %c0_18] : memref<64x1xf32, #tpu.memory_space<vmem>>, vector<64x1xf32>
    %22 = vector.broadcast %21 : vector<64x1xf32> to vector<64x1024xf32>
    %23 = arith.addf %20, %22 : vector<64x1024xf32>
    %cst_19 = arith.constant 0.000000e+00 : f32
    %24 = vector.broadcast %cst_19 : f32 to vector<64x1024xf32>
    %25 = arith.maximumf %23, %24 : vector<64x1024xf32>
    %c0_20 = arith.constant 0 : index
    %c0_21 = arith.constant 0 : index
    %26 = vector.load %arg10[%c0_20, %c0_21] : memref<64x128xf32, #tpu.memory_space<vmem>>, vector<64x128xf32>
    %27 = vector.extract_strided_slice %25 {offsets = [0, 0], sizes = [64, 128], strides = [1, 1]} : vector<64x1024xf32> to vector<64x128xf32>
    %28 = arith.maximumf %26, %27 : vector<64x128xf32>
    %29 = vector.extract_strided_slice %25 {offsets = [0, 128], sizes = [64, 128], strides = [1, 1]} : vector<64x1024xf32> to vector<64x128xf32>
    %30 = arith.maximumf %28, %29 : vector<64x128xf32>
    %31 = vector.extract_strided_slice %25 {offsets = [0, 256], sizes = [64, 128], strides = [1, 1]} : vector<64x1024xf32> to vector<64x128xf32>
    %32 = arith.maximumf %30, %31 : vector<64x128xf32>
    %33 = vector.extract_strided_slice %25 {offsets = [0, 384], sizes = [64, 128], strides = [1, 1]} : vector<64x1024xf32> to vector<64x128xf32>
    %34 = arith.maximumf %32, %33 : vector<64x128xf32>
    %35 = vector.extract_strided_slice %25 {offsets = [0, 512], sizes = [64, 128], strides = [1, 1]} : vector<64x1024xf32> to vector<64x128xf32>
    %36 = arith.maximumf %34, %35 : vector<64x128xf32>
    %37 = vector.extract_strided_slice %25 {offsets = [0, 640], sizes = [64, 128], strides = [1, 1]} : vector<64x1024xf32> to vector<64x128xf32>
    %38 = arith.maximumf %36, %37 : vector<64x128xf32>
    %39 = vector.extract_strided_slice %25 {offsets = [0, 768], sizes = [64, 128], strides = [1, 1]} : vector<64x1024xf32> to vector<64x128xf32>
    %40 = arith.maximumf %38, %39 : vector<64x128xf32>
    %41 = vector.extract_strided_slice %25 {offsets = [0, 896], sizes = [64, 128], strides = [1, 1]} : vector<64x1024xf32> to vector<64x128xf32>
    %42 = arith.maximumf %40, %41 : vector<64x128xf32>
    %c0_22 = arith.constant 0 : index
    %c0_23 = arith.constant 0 : index
    %43 = vector.load %arg10[%c0_22, %c0_23] : memref<64x128xf32, #tpu.memory_space<vmem>>, vector<64x128xf32>
    tpu.vector_store %arg10[%c0_22, %c0_23], %42 {strides = array<i32>} : memref<64x128xf32, #tpu.memory_space<vmem>>, vector<64x128xf32>,
    %c0_i32_24 = arith.constant 0 : i32
    %44 = arith.cmpi eq, %arg1, %c0_i32_24 : i32
    %45 = arith.extui %44 : i1 to i32
    %c0_i32_25 = arith.constant 0 : i32
    %46 = arith.cmpi ne, %45, %c0_i32_25 : i32
    scf.if %46 {
      %c0_26 = arith.constant 0 : index
      %c0_27 = arith.constant 0 : index
      %47 = vector.load %arg10[%c0_26, %c0_27] : memref<64x128xf32, #tpu.memory_space<vmem>>, vector<64x128xf32>
      %cst_28 = arith.constant dense<0xFF800000> : vector<64xf32>
      %48 = vector.multi_reduction <maximumf>, %47, %cst_28 [1] : vector<64x128xf32> to vector<64xf32>
      %49 = vector.shape_cast %48 : vector<64xf32> to vector<1x1x64xf32>
      %c0_29 = arith.constant 0 : index
      %c0_30 = arith.constant 0 : index
      %c0_31 = arith.constant 0 : index
      %50 = vector.load %arg9[%c0_29, %c0_30, %c0_31] : memref<1x1x64xf32, #tpu.memory_space<vmem>>, vector<1x1x64xf32>
      tpu.vector_store %arg9[%c0_29, %c0_30, %c0_31], %49 {strides = array<i32>} : memref<1x1x64xf32, #tpu.memory_space<vmem>>, vector<1x1x64xf32>,
    } else {
    }
    return
  }
  func.func @transform_0(%arg0: i32, %arg1: i32) -> (i32, i32, i32) {
    %c0_i32 = arith.constant 0 : i32
    %c0_i32_0 = arith.constant 0 : i32
    return %arg0, %c0_i32, %arg1 : i32, i32, i32
  }
  func.func @transform_1(%arg0: i32, %arg1: i32) -> (i32, i32) {
    %c0_i32 = arith.constant 0 : i32
    %c0_i32_0 = arith.constant 0 : i32
    %c0_i32_1 = arith.constant 0 : i32
    return %c0_i32, %c0_i32_0 : i32, i32
  }
  func.func @transform_2(%arg0: i32, %arg1: i32) -> (i32, i32) {
    %c0_i32 = arith.constant 0 : i32
    %c0_i32_0 = arith.constant 0 : i32
    %c0_i32_1 = arith.constant 0 : i32
    return %c0_i32, %c0_i32_0 : i32, i32
  }
  func.func @transform_3(%arg0: i32, %arg1: i32) -> (i32, i32) {
    %c0_i32 = arith.constant 0 : i32
    %c0_i32_0 = arith.constant 0 : i32
    %c0_i32_1 = arith.constant 0 : i32
    return %c0_i32, %c0_i32_0 : i32, i32
  }
  func.func @transform_4(%arg0: i32, %arg1: i32) -> (i32, i32) {
    %c0_i32 = arith.constant 0 : i32
    %c0_i32_0 = arith.constant 0 : i32
    %c0_i32_1 = arith.constant 0 : i32
    return %c0_i32, %c0_i32_0 : i32, i32
  }
  func.func @transform_5(%arg0: i32, %arg1: i32) -> (i32, i32) {
    %c0_i32 = arith.constant 0 : i32
    %c0_i32_0 = arith.constant 0 : i32
    %c0_i32_1 = arith.constant 0 : i32
    return %c0_i32, %c0_i32_0 : i32, i32
  }
  func.func @transform_6(%arg0: i32, %arg1: i32) -> (i32, i32) {
    %c0_i32 = arith.constant 0 : i32
    %c0_i32_0 = arith.constant 0 : i32
    %c0_i32_1 = arith.constant 0 : i32
    return %c0_i32, %c0_i32_0 : i32, i32
  }
  func.func @transform_7(%arg0: i32, %arg1: i32) -> (i32, i32, i32) {
    %c0_i32 = arith.constant 0 : i32
    %c0_i32_0 = arith.constant 0 : i32
    %c0_i32_1 = arith.constant 0 : i32
    return %arg0, %c0_i32, %c0_i32_0 : i32, i32, i32
  }
}

module attributes {stable_mosaic.version = 11 : i64} {
  func.func @kernel(%arg0: i32, %arg1: i32, %arg2: memref<1x8x1024xf32, #tpu.memory_space<vmem>>, %arg3: memref<16x8xf32, #tpu.memory_space<vmem>>, %arg4: memref<32x16xf32, #tpu.memory_space<vmem>>, %arg5: memref<64x32xf32, #tpu.memory_space<vmem>>, %arg6: memref<16x1xf32, #tpu.memory_space<vmem>>, %arg7: memref<32x1xf32, #tpu.memory_space<vmem>>, %arg8: memref<64x1xf32, #tpu.memory_space<vmem>>, %arg9: memref<1x1x64xf32, #tpu.memory_space<vmem>>, %arg10: memref<64x128xf32, #tpu.memory_space<vmem>>) attributes {dimension_semantics = [#tpu.dimension_semantics<parallel>, #tpu.dimension_semantics<arbitrary>], iteration_bounds = array<i64: 2, 1>, scalar_prefetch = 0 : i64, scratch_operands = 1 : i64, tpu.core_type = #tpu.core_type<tc>, window_params = [{transform_indices = @transform_0, window_bounds = array<i64: 1, 8, 1024>}, {pipeline_mode = #tpu.pipeline_mode<synchronous>, transform_indices = @transform_1, window_bounds = array<i64: 16, 8>}, {pipeline_mode = #tpu.pipeline_mode<synchronous>, transform_indices = @transform_2, window_bounds = array<i64: 32, 16>}, {pipeline_mode = #tpu.pipeline_mode<synchronous>, transform_indices = @transform_3, window_bounds = array<i64: 64, 32>}, {pipeline_mode = #tpu.pipeline_mode<synchronous>, transform_indices = @transform_4, window_bounds = array<i64: 16, 1>}, {pipeline_mode = #tpu.pipeline_mode<synchronous>, transform_indices = @transform_5, window_bounds = array<i64: 32, 1>}, {pipeline_mode = #tpu.pipeline_mode<synchronous>, transform_indices = @transform_6, window_bounds = array<i64: 64, 1>}, {transform_indices = @transform_7, window_bounds = array<i64: 1, 1, 64>}]} {
    %c0_i32 = arith.constant 0 : i32
    %0 = arith.cmpi eq, %arg1, %c0_i32 : i32
    %1 = arith.extui %0 : i1 to i32
    %c0_i32_0 = arith.constant 0 : i32
    %2 = arith.cmpi ne, %1, %c0_i32_0 : i32
    scf.if %2 {
      %cst_26 = arith.constant 0xFF800000 : f32
      %47 = vector.broadcast %cst_26 : f32 to vector<64x128xf32>
      %c0_27 = arith.constant 0 : index
      %c0_28 = arith.constant 0 : index
      %48 = vector.load %arg10[%c0_27, %c0_28] : memref<64x128xf32, #tpu.memory_space<vmem>>, vector<64x128xf32>
      tpu.vector_store %arg10[%c0_27, %c0_28], %47 {strides = array<i32>} : memref<64x128xf32, #tpu.memory_space<vmem>>, vector<64x128xf32>,
    } else {
    }
    %c0 = arith.constant 0 : index
    %c0_1 = arith.constant 0 : index
    %c0_2 = arith.constant 0 : index
    %3 = vector.load %arg2[%c0, %c0_1, %c0_2] : memref<1x8x1024xf32, #tpu.memory_space<vmem>>, vector<1x8x1024xf32>
    %4 = vector.shape_cast %3 : vector<1x8x1024xf32> to vector<8x1024xf32>
    %c0_3 = arith.constant 0 : index
    %c0_4 = arith.constant 0 : index
    %5 = vector.load %arg3[%c0_3, %c0_4] : memref<16x8xf32, #tpu.memory_space<vmem>>, vector<16x8xf32>
    %cst = arith.constant dense<0.000000e+00> : vector<16x1024xf32>
    %6 = tpu.matmul %5, %4, %cst {dimension_numbers = #tpu.dot_dimension_numbers<[1], [0], [0], [1], [0, 0, 1, 1], [], []>} : vector<16x8xf32>, vector<8x1024xf32>, vector<16x1024xf32> -> vector<16x1024xf32>
    %c0_5 = arith.constant 0 : index
    %c0_6 = arith.constant 0 : index
    %7 = vector.load %arg6[%c0_5, %c0_6] : memref<16x1xf32, #tpu.memory_space<vmem>>, vector<16x1xf32>
    %8 = vector.broadcast %7 : vector<16x1xf32> to vector<16x1024xf32>
    %9 = arith.addf %6, %8 : vector<16x1024xf32>
    %cst_7 = arith.constant 0.000000e+00 : f32
    %10 = vector.broadcast %cst_7 : f32 to vector<16x1024xf32>
    %11 = arith.maximumf %9, %10 : vector<16x1024xf32>
    %c0_8 = arith.constant 0 : index
    %c0_9 = arith.constant 0 : index
    %12 = vector.load %arg4[%c0_8, %c0_9] : memref<32x16xf32, #tpu.memory_space<vmem>>, vector<32x16xf32>
    %cst_10 = arith.constant dense<0.000000e+00> : vector<32x1024xf32>
    %13 = tpu.matmul %12, %11, %cst_10 {dimension_numbers = #tpu.dot_dimension_numbers<[1], [0], [0], [1], [0, 0, 1, 1], [], []>} : vector<32x16xf32>, vector<16x1024xf32>, vector<32x1024xf32> -> vector<32x1024xf32>
    %c0_11 = arith.constant 0 : index
    %c0_12 = arith.constant 0 : index
    %14 = vector.load %arg7[%c0_11, %c0_12] : memref<32x1xf32, #tpu.memory_space<vmem>>, vector<32x1xf32>
    %15 = vector.broadcast %14 : vector<32x1xf32> to vector<32x1024xf32>
    %16 = arith.addf %13, %15 : vector<32x1024xf32>
    %cst_13 = arith.constant 0.000000e+00 : f32
    %17 = vector.broadcast %cst_13 : f32 to vector<32x1024xf32>
    %18 = arith.maximumf %16, %17 : vector<32x1024xf32>
    %c0_14 = arith.constant 0 : index
    %c0_15 = arith.constant 0 : index
    %19 = vector.load %arg5[%c0_14, %c0_15] : memref<64x32xf32, #tpu.memory_space<vmem>>, vector<64x32xf32>
    %cst_16 = arith.constant dense<0.000000e+00> : vector<64x1024xf32>
    %20 = tpu.matmul %19, %18, %cst_16 {dimension_numbers = #tpu.dot_dimension_numbers<[1], [0], [0], [1], [0, 0, 1, 1], [], []>} : vector<64x32xf32>, vector<32x1024xf32>, vector<64x1024xf32> -> vector<64x1024xf32>
    %c0_17 = arith.constant 0 : index
    %c0_18 = arith.constant 0 : index
    %21 = vector.load %arg8[%c0_17, %c0_18] : memref<64x1xf32, #tpu.memory_space<vmem>>, vector<64x1xf32>
    %22 = vector.broadcast %21 : vector<64x1xf32> to vector<64x1024xf32>
    %23 = arith.addf %20, %22 : vector<64x1024xf32>
    %cst_19 = arith.constant 0.000000e+00 : f32
    %24 = vector.broadcast %cst_19 : f32 to vector<64x1024xf32>
    %25 = arith.maximumf %23, %24 : vector<64x1024xf32>
    %c0_20 = arith.constant 0 : index
    %c0_21 = arith.constant 0 : index
    %26 = vector.load %arg10[%c0_20, %c0_21] : memref<64x128xf32, #tpu.memory_space<vmem>>, vector<64x128xf32>
    %27 = vector.extract_strided_slice %25 {offsets = [0, 0], sizes = [64, 128], strides = [1, 1]} : vector<64x1024xf32> to vector<64x128xf32>
    %28 = arith.maximumf %26, %27 : vector<64x128xf32>
    %29 = vector.extract_strided_slice %25 {offsets = [0, 128], sizes = [64, 128], strides = [1, 1]} : vector<64x1024xf32> to vector<64x128xf32>
    %30 = arith.maximumf %28, %29 : vector<64x128xf32>
    %31 = vector.extract_strided_slice %25 {offsets = [0, 256], sizes = [64, 128], strides = [1, 1]} : vector<64x1024xf32> to vector<64x128xf32>
    %32 = arith.maximumf %30, %31 : vector<64x128xf32>
    %33 = vector.extract_strided_slice %25 {offsets = [0, 384], sizes = [64, 128], strides = [1, 1]} : vector<64x1024xf32> to vector<64x128xf32>
    %34 = arith.maximumf %32, %33 : vector<64x128xf32>
    %35 = vector.extract_strided_slice %25 {offsets = [0, 512], sizes = [64, 128], strides = [1, 1]} : vector<64x1024xf32> to vector<64x128xf32>
    %36 = arith.maximumf %34, %35 : vector<64x128xf32>
    %37 = vector.extract_strided_slice %25 {offsets = [0, 640], sizes = [64, 128], strides = [1, 1]} : vector<64x1024xf32> to vector<64x128xf32>
    %38 = arith.maximumf %36, %37 : vector<64x128xf32>
    %39 = vector.extract_strided_slice %25 {offsets = [0, 768], sizes = [64, 128], strides = [1, 1]} : vector<64x1024xf32> to vector<64x128xf32>
    %40 = arith.maximumf %38, %39 : vector<64x128xf32>
    %41 = vector.extract_strided_slice %25 {offsets = [0, 896], sizes = [64, 128], strides = [1, 1]} : vector<64x1024xf32> to vector<64x128xf32>
    %42 = arith.maximumf %40, %41 : vector<64x128xf32>
    %c0_22 = arith.constant 0 : index
    %c0_23 = arith.constant 0 : index
    %43 = vector.load %arg10[%c0_22, %c0_23] : memref<64x128xf32, #tpu.memory_space<vmem>>, vector<64x128xf32>
    tpu.vector_store %arg10[%c0_22, %c0_23], %42 {strides = array<i32>} : memref<64x128xf32, #tpu.memory_space<vmem>>, vector<64x128xf32>,
    %c0_i32_24 = arith.constant 0 : i32
    %44 = arith.cmpi eq, %arg1, %c0_i32_24 : i32
    %45 = arith.extui %44 : i1 to i32
    %c0_i32_25 = arith.constant 0 : i32
    %46 = arith.cmpi ne, %45, %c0_i32_25 : i32
    scf.if %46 {
      %c0_26 = arith.constant 0 : index
      %c0_27 = arith.constant 0 : index
      %47 = vector.load %arg10[%c0_26, %c0_27] : memref<64x128xf32, #tpu.memory_space<vmem>>, vector<64x128xf32>
      %cst_28 = arith.constant dense<0xFF800000> : vector<64xf32>
      %48 = vector.multi_reduction <maximumf>, %47, %cst_28 [1] : vector<64x128xf32> to vector<64xf32>
      %49 = vector.shape_cast %48 : vector<64xf32> to vector<1x1x64xf32>
      %c0_29 = arith.constant 0 : index
      %c0_30 = arith.constant 0 : index
      %c0_31 = arith.constant 0 : index
      %50 = vector.load %arg9[%c0_29, %c0_30, %c0_31] : memref<1x1x64xf32, #tpu.memory_space<vmem>>, vector<1x1x64xf32>
      tpu.vector_store %arg9[%c0_29, %c0_30, %c0_31], %49 {strides = array<i32>} : memref<1x1x64xf32, #tpu.memory_space<vmem>>, vector<1x1x64xf32>,
    } else {
    }
    return
  }
  func.func @transform_0(%arg0: i32, %arg1: i32) -> (i32, i32, i32) {
    %c0_i32 = arith.constant 0 : i32
    %c0_i32_0 = arith.constant 0 : i32
    return %arg0, %c0_i32, %arg1 : i32, i32, i32
  }
  func.func @transform_1(%arg0: i32, %arg1: i32) -> (i32, i32) {
    %c0_i32 = arith.constant 0 : i32
    %c0_i32_0 = arith.constant 0 : i32
    %c0_i32_1 = arith.constant 0 : i32
    return %c0_i32, %c0_i32_0 : i32, i32
  }
  func.func @transform_2(%arg0: i32, %arg1: i32) -> (i32, i32) {
    %c0_i32 = arith.constant 0 : i32
    %c0_i32_0 = arith.constant 0 : i32
    %c0_i32_1 = arith.constant 0 : i32
    return %c0_i32, %c0_i32_0 : i32, i32
  }
  func.func @transform_3(%arg0: i32, %arg1: i32) -> (i32, i32) {
    %c0_i32 = arith.constant 0 : i32
    %c0_i32_0 = arith.constant 0 : i32
    %c0_i32_1 = arith.constant 0 : i32
    return %c0_i32, %c0_i32_0 : i32, i32
  }
  func.func @transform_4(%arg0: i32, %arg1: i32) -> (i32, i32) {
    %c0_i32 = arith.constant 0 : i32
    %c0_i32_0 = arith.constant 0 : i32
    %c0_i32_1 = arith.constant 0 : i32
    return %c0_i32, %c0_i32_0 : i32, i32
  }
  func.func @transform_5(%arg0: i32, %arg1: i32) -> (i32, i32) {
    %c0_i32 = arith.constant 0 : i32
    %c0_i32_0 = arith.constant 0 : i32
    %c0_i32_1 = arith.constant 0 : i32
    return %c0_i32, %c0_i32_0 : i32, i32
  }
  func.func @transform_6(%arg0: i32, %arg1: i32) -> (i32, i32) {
    %c0_i32 = arith.constant 0 : i32
    %c0_i32_0 = arith.constant 0 : i32
    %c0_i32_1 = arith.constant 0 : i32
    return %c0_i32, %c0_i32_0 : i32, i32
  }
  func.func @transform_7(%arg0: i32, %arg1: i32) -> (i32, i32, i32) {
    %c0_i32 = arith.constant 0 : i32
    %c0_i32_0 = arith.constant 0 : i32
    %c0_i32_1 = arith.constant 0 : i32
    return %arg0, %c0_i32, %c0_i32_0 : i32, i32, i32
  }
}

</mosaic_0001>

<bundles_post_ra>
// kernel: tpu_custom_call.1
= control target key start
LH: loop header
LB: loop body
LE: loop exit
PB: predicated region body
PF: predicated region fallthrough
CT: control target
= control target key end

     0   :  { %12 = vsyncpa [#allocation4], 0  ;;  %s2698_s0 = inlined_call_operand.vmem [shape: f32[2,8,1024], index: 0, kind: input, shape index: {}]   ;;  %s2699_s1 = inlined_call_operand.vmem [shape: f32[16,8], index: 1, kind: input, shape index: {}]   ;;  %s2700_s2 = inlined_call_operand.vmem [shape: f32[32,16], index: 2, kind: input, shape index: {}]   ;;  %s2701_s3 = inlined_call_operand.vmem [shape: f32[64,32], index: 3, kind: input, shape index: {}]   ;;  %s2702_s4 = inlined_call_operand.vmem [shape: f32[16,1], index: 4, kind: input, shape index: {}]   ;;  %s2703_s5 = inlined_call_operand.vmem [shape: f32[32,1], index: 5, kind: input, shape index: {}]   ;;  %s2704_s6 = inlined_call_operand.vmem [shape: f32[64,1], index: 6, kind: input, shape index: {}]   ;;  %s2705_s7 = inlined_call_operand.hbm [shape: f32[2,1,64], index: 7, kind: output, shape index: {}]  }
   0x1   :  { %14 = vsyncpa [#allocation4 + $0x1], 0  ;;  %s2197_s24 = smov 0   ;;  %s2199_s25 = smov 0  }
   0x2   :  { %s2201_s26 = smov 0   ;;  %s2203_s27 = smov 0  }
   0x3   :  { %s2205_s28 = smov 0   ;;  %s2207_s29 = smov 0  }
   0x4 LB: > { %s1950_s30 = sadd.s32 4294967295, %s2152_s29   ;;  %s1951_s8 = sadd.s32 4294967294, %s2152_s29   ;;  %s2152_s29 = sphi %s2207_s29, %s20_s29   ;;  %s2148_s28 = sphi %s2205_s28, %s2712_s28   ;;  %s2144_s27 = sphi %s2203_s27, %s2711_s27   ;;  %s2140_s26 = sphi %s2201_s26, %s2710_s26   ;;  %s2136_s25 = sphi %s2199_s25, %s2709_s25   ;;  %s2132_s24 = sphi %s2197_s24, %s2708_s24  }
   0x5   : > { %s32_s9 = sadd.s32 1, %s2148_s28  ;;  %s193_s10 = sadd.s32 1, %s2140_s26 }
   0x6   : > { %p34_p0 = scmp.ge.s32.totalorder %s32_s9, 2  ;;  %p203_p1 = scmp.ne.s32.totalorder %s2140_s26, %s2136_s25 }
   0x7   : > { %p204_p2 = scmp.eq.s32.totalorder %s1950_s30, 1  ;;  %p209_p3 = scmp.ne.s32.totalorder %s2136_s25, %s2132_s24 }
   0x8   : > { %s2714_s9 = smov (%p34_p0, %s32_s9), 0  ;;  %p210_p5 = scmp.eq.s32.totalorder %s1951_s8, 1 }
   0x9   : > { %p2237_p4 = por %p204_p2, %p203_p1  ;;  %s190_s12 = ssub.s32 %s2148_s28, %s2714_s9 }
   0xa   : > { %p1954_p6 = scmp.ge.s32.totalorder %s2152_s29, 1  ;;  %p191_p7 = scmp.eq.s32.totalorder %s190_s12, 0 }
   0xb   : > { %p2244_p8 = por %p210_p5, %p209_p3  ;;  %p259_p9 = scmp.lt.s32.totalorder %s2152_s29, 3 }
   0xc   : > { %s2250_s14 = scalar_select %p191_p7, %s2140_s26, %s193_s10  }
   0xd   : > { %p260_p10 = pnand %p1954_p6, %p259_p9 }
   0xe   : > { %p295_p11 = scmp.lt.s32.totalorder (!%p260_p10), %s2144_s27, 1  ;;  %s292_s30 = sand.u32 (!%p260_p10), 1, %s2136_s25  }
   0xf   : > { %263 = sbr.rel (%p260_p10) target bundleno = 878 (0x36e), region = 48  ;;  %s2013_s8 = sshll.u32 (!%p260_p10), %s2144_s27, 4 }
  0x10   : > { %s293_s10 = scalar_lea.vmem (!%p260_p10), [#allocation3], %s292_s30  ;;  %s2156_s19 = smov (!%p260_p10), [#allocation3]  }
  0x11   : > { %s1881_s12 = sshll.u32 (!%p260_p10), %s293_s10, 4  ;;  %s2080_s20 = sshll.u32 (!%p260_p10), %s2156_s19, 4  ;;  %s1882_s12 = int_to_ptr.vmem [resolvable:$true] %s1881_s12  ;;  %s2081_s20 = int_to_ptr.vmem [resolvable:$false] %s2080_s20 }
  0x12   : > { %p2083_p1 = scmp.lt.s32.totalorder (!%p260_p10), %s1882_s12, %s2081_s20 }
  0x14   : > { %v2154_v0 = vmov 0.0   ;;  %v327_v1 = vld [vmem:[%s2702_s4 + $0x8] sm:$0xff]  ;;  %s296_s17 = scalar_select %p295_p11, %s2144_s27, 1  ;;  %v2155_v2 = vmov 0   ;;  %v324_v3 = vld [vmem:[%s2699_s1] sm:$0xff]  ;;  %vm338_vm0 = vcmask 64512  }
  0x15   : > { %409 = vmatprep.mubr.f32.mxu0 %v2154_v0  ;;  %486 = vmatprep.mubr.f32.mxu1 %v2154_v0  ;;  %v325_v12 = vld [vmem:[%s2699_s1 + $0x8] sm:$0xff]  ;;  %v326_v13 = vld [vmem:[%s2702_s4] sm:$0xff]  ;;  %v1108_v16 = vld [vmem:[%s2704_s6 + $0x10] sm:$0xff]  ;;  %vm697_vm1 = vcmask 130048   ;;  %vm1154_vm2 = vcmask 261120   ;;  %vm1821_vm3 = vcmask 130112  }
  0x16   : > { %2074 = vset.pattern.permute.xlu0 %v2155_v2  ;;  %2075 = vset.pattern.permute.xlu1 %v2155_v2  ;;  %s2016_s18 = sshll.u32 %s296_s17, 6  ;;  %v674_v14 = vld [vmem:[%s2703_s5 + $0x8] sm:$0xff]  ;;  %v1106_v15 = vld [vmem:[%s2704_s6] sm:$0xff]  ;;  %v1112_v18 = vld [vmem:[%s2704_s6 + $0x30] sm:$0xff]  ;;  %vm1828_vm4 = vcmask 195712   ;;  %vm1835_vm5 = vcmask 261312   ;;  %s2656_s17 = scalar_lea.hbm %s2705_s7, %s2013_s8 }
  0x17   : > { %335 = vperm.xlu0 %2074, %v327_v1   ;;  %s302_s21 = scalar_lea.vmem %s2698_s0, %s2016_s18  ;;  %v1110_v17 = vld [vmem:[%s2704_s6 + $0x20] sm:$0xff]  ;;  %v676_v19 = vld [vmem:[%s2703_s5 + $0x18] sm:$0xff]  ;;  %v675_v20 = vld [vmem:[%s2703_s5 + $0x10] sm:$0xff]  ;;  %vm1842_vm6 = vcmask 326912   ;;  %vm1849_vm7 = vcmask 392512   ;;  %vm1856_vm8 = vcmask 458112  }
  0x18   : > { %v317_v4 = vld [vmem:[%s302_s21 + $0x8] sm:$0xff]  ;;  %v319_v5 = vld [vmem:[%s302_s21 + $0x18] sm:$0xff]  ;;  %v316_v6 = vld [vmem:[%s302_s21] sm:$0xff]  ;;  %694 = vperm.xlu1 %2075, %v676_v19   ;;  %vm1863_vm9 = vcmask 523712   ;;  %vm1866_vm10 = vcmask 516096   ;;  %s1869_s27 = scalar_lea.sflag [#allocation4], %s292_s30 }
  0x19   : > { %375 = vmatprep.subr.mxu0 %v317_v4  ;;  %452 = vmatprep.subr.mxu1 %v319_v5  ;;  %v318_v7 = vld [vmem:[%s302_s21 + $0x10] sm:$0xff]  ;;  %v321_v8 = vld [vmem:[%s302_s21 + $0x28] sm:$0xff]  ;;  %v323_v9 = vld [vmem:[%s302_s21 + $0x38] sm:$0xff]  ;;  %s2076_s18 = scalar_lea.vmem %s1882_s12, 16 }
  0x1a   : > { %376 = vmatpush1.msra.mxu0 %v316_v6  ;;  %453 = vmatpush1.msra.mxu1 %v318_v7  ;;  %v320_v10 = vld [vmem:[%s302_s21 + $0x20] sm:$0xff]  ;;  %v322_v11 = vld [vmem:[%s302_s21 + $0x30] sm:$0xff]  ;;  %v1107_v22 = vld [vmem:[%s2704_s6 + $0x8] sm:$0xff]  ;;  %p2077_p12 = scmp.ne.s32.totalorder %s1882_s12, %s2076_s18  ;;  %s2082_s21 = scalar_lea.vmem %s2081_s20, 32 }
  0x1b   : > { %1957 = vmatmul.mubr.msk.f32.vlgmr.msra.gmra.mxu0 %vm338_vm0, %v324_v3  ;;  %1959 = vmatmul.mubr.msk.f32.vlgmr.msra.gmra.mxu1 %vm338_vm0, %v324_v3  ;;  %v673_v21 = vld [vmem:[%s2703_s5] sm:$0xff]  ;;  %v1109_v23 = vld [vmem:[%s2704_s6 + $0x18] sm:$0xff]  ;;  %v1111_v24 = vld [vmem:[%s2704_s6 + $0x28] sm:$0xff]  ;;  %p2084_p2 = scmp.lt.s32.totalorder %s2082_s21, %s2076_s18 }
  0x1c   : > { %415 = vmatprep.mubr.f32.mxu0 %v2154_v0  ;;  %492 = vmatprep.mubr.f32.mxu1 %v2154_v0  ;;  %v1113_v25 = vld [vmem:[%s2704_s6 + $0x38] sm:$0xff]  ;;  %v669_v58 = vld [vmem:[%s2700_s2] sm:$0xff]  ;;  %v670_v4 = vld [vmem:[%s2700_s2 + $0x8] sm:$0xff]  ;;  %p2078_p13 = pnand %p2077_p12, %p2237_p4 }
  0x1d   : > { %529 = vmatprep.subr.mxu0 %v321_v8  ;;  %606 = vmatprep.subr.mxu1 %v323_v9  ;;  %p2085_p3 = por %p2084_p2, %p2083_p1 }
  0x1e   : > { %530 = vmatpush1.msra.mxu0 %v320_v10  ;;  %607 = vmatpush1.msra.mxu1 %v322_v11  ;;  %p2079_p0 = pneg %p2078_p13 }
  0x1f   : > { %1958 = vmatmul.mubr.msk.f32.gmra.mxu0 %vm338_vm0, %v325_v12  ;;  %1960 = vmatmul.mubr.msk.f32.gmra.mxu1 %vm338_vm0, %v325_v12 }
  0x20   : > { %563 = vmatprep.mubr.f32.mxu0 %v2154_v0  ;;  %640 = vmatprep.mubr.f32.mxu1 %v2154_v0  ;;  %p2086_p5 = pnand %p2085_p3, %p2079_p0 }
  0x21   : > { %330 = vperm.xlu0 %2074, %v326_v13   ;;  %689 = vperm.xlu1 %2075, %v675_v20  }
  0x23   : > { %1961 = vmatmul.mubr.msk.f32.vlgmr.msra.gmra.mxu0 %vm338_vm0, %v324_v3  ;;  %1963 = vmatmul.mubr.msk.f32.vlgmr.msra.gmra.mxu1 %vm338_vm0, %v324_v3 }
  0x24   : > { %569 = vmatprep.mubr.f32.mxu0 %v2154_v0  ;;  %646 = vmatprep.mubr.f32.mxu1 %v2154_v0 }
  0x25   : > { %684 = vperm.xlu0 %2074, %v674_v14   ;;  %679 = vperm.xlu1 %2075, %v673_v21  }
  0x27   : > { %1962 = vmatmul.mubr.msk.f32.gmra.mxu0 %vm338_vm0, %v325_v12  ;;  %1964 = vmatmul.mubr.msk.f32.gmra.mxu1 %vm338_vm0, %v325_v12 }
  0x28   : > { %774 = vmatprep.mubr.f32.mxu0 %v2154_v0  ;;  %863 = vmatprep.mubr.f32.mxu1 %v2154_v0 }
  0x29   : > { %1116 = vperm.xlu0 %2074, %v1106_v15   ;;  %1121 = vperm.xlu1 %2075, %v1107_v22   ;;  %v671_v15 = vld [vmem:[%s2700_s2 + $0x10] sm:$0xff] }
  0x2d   : > { %1126 = vperm.xlu0 %2074, %v1108_v16   ;;  %1131 = vperm.xlu1 %2075, %v1109_v23   ;;  %v672_v16 = vld [vmem:[%s2700_s2 + $0x18] sm:$0xff] }
  0x31   : > { %1136 = vperm.xlu0 %2074, %v1110_v17   ;;  %1141 = vperm.xlu1 %2075, %v1111_v24  }
  0x35   : > { %1146 = vperm.xlu0 %2074, %v1112_v18   ;;  %1151 = vperm.xlu1 %2075, %v1113_v25  }
  0x92   : > { %v336_v26 = vpop.permute.xlu0 %335 }
  0x93   : > { %v2367_v25 = vpop.permute.xlu1 %694 }
  0x9c   : > { %v331_v33 = vpop.permute.xlu0 %330 }
  0xdb   : > { %v411_v27 = vpop.f32.mrf.mxu0  ;;  %v488_v28 = vpop.f32.mrf.mxu1 }
  0xdc   : > { %v412_v42 = vadd.f32 %v411_v27, %v331_v33  ;;  %v489_v43 = vadd.f32 %v488_v28, %v331_v33 }
  0xdd   : > { %v413_v29 = vpop.f32.mrf.mxu0  ;;  %v490_v30 = vpop.f32.mrf.mxu1 }
  0xde   : > { %v414_v38 = vadd.f32 %v413_v29, %v331_v33  ;;  %v491_v39 = vadd.f32 %v490_v30, %v331_v33  ;;  %v653_v54 = vmax.f32 %v412_v42, 0.0  ;;  %v655_v55 = vmax.f32 %v489_v43, 0.0  ;;  %v2369_v30 = vpop.permute.xlu1 %689 }
  0xdf   : > { %v417_v31 = vpop.f32.mrf.mxu0  ;;  %v494_v32 = vpop.f32.mrf.mxu1 }
  0xe0   : > { %v418_v34 = vadd.f32 %v417_v31, %v336_v26  ;;  %v495_v35 = vadd.f32 %v494_v32, %v336_v26  ;;  %v654_v52 = vmax.f32 %v414_v38, 0.0  ;;  %v656_v53 = vmax.f32 %v491_v39, 0.0 }
  0xe1   : > { %v419_v36 = vpop.f32.mrf.mxu0  ;;  %v496_v37 = vpop.f32.mrf.mxu1 }
  0xe2   : > { %v420_v40 = vadd.f32 %v419_v36, %v336_v26  ;;  %v497_v41 = vadd.f32 %v496_v37, %v336_v26  ;;  %v661_v48 = vmax.f32 %v418_v34, 0.0  ;;  %v663_v49 = vmax.f32 %v495_v35, 0.0  ;;  %v2373_v37 = vpop.permute.xlu0 %684 }
  0xe3   : > { %v565_v44 = vpop.f32.mrf.mxu0  ;;  %v642_v45 = vpop.f32.mrf.mxu1 }
  0xe4   : > { %v662_v46 = vmax.f32 %v420_v40, 0.0  ;;  %v664_v47 = vmax.f32 %v497_v41, 0.0  ;;  %v566_v7 = vadd.f32 %v565_v44, %v331_v33  ;;  %v643_v8 = vadd.f32 %v642_v45, %v331_v33 }
  0xe5   : > { %v567_v50 = vpop.f32.mrf.mxu0  ;;  %v644_v51 = vpop.f32.mrf.mxu1 }
  0xe6   : > { %738 = vmatprep.subr.mxu0 %v662_v46  ;;  %827 = vmatprep.subr.mxu1 %v664_v47  ;;  %v568_v2 = vadd.f32 %v567_v50, %v331_v33  ;;  %v645_v3 = vadd.f32 %v644_v51, %v331_v33  ;;  %v657_v13 = vmax.f32 %v566_v7, 0.0  ;;  %v659_v14 = vmax.f32 %v643_v8, 0.0  ;;  %v2385_v46 = vpop.permute.xlu1 %679 }
  0xe7   : > { %v571_v56 = vpop.f32.mrf.mxu0  ;;  %v648_v57 = vpop.f32.mrf.mxu1  ;;  %739 = vmatpush1.msra.mxu0 %v661_v48  ;;  %828 = vmatpush1.msra.mxu1 %v663_v49 }
  0xe8   : > { %740 = vmatprep.subr.mxu0 %v654_v52  ;;  %829 = vmatprep.subr.mxu1 %v656_v53  ;;  %v572_v59 = vadd.f32 %v571_v56, %v336_v26  ;;  %v649_v62 = vadd.f32 %v648_v57, %v336_v26  ;;  %v658_v11 = vmax.f32 %v568_v2, 0.0  ;;  %v660_v12 = vmax.f32 %v645_v3, 0.0 }
  0xe9   : > { %v573_v60 = vpop.f32.mrf.mxu0  ;;  %v650_v61 = vpop.f32.mrf.mxu1  ;;  %741 = vmatpush1.msra.mxu0 %v653_v54  ;;  %830 = vmatpush1.msra.mxu1 %v655_v55 }
  0xea   : > { %v574_v63 = vadd.f32 %v573_v60, %v336_v26  ;;  %v651_v1 = vadd.f32 %v650_v61, %v336_v26  ;;  %1965 = vmatmul.mubr.msk.f32.vlgmr.msra.gmra.mxu0 %vm697_vm1, %v669_v58  ;;  %1969 = vmatmul.mubr.msk.f32.vlgmr.msra.gmra.mxu1 %vm697_vm1, %v669_v58  ;;  %v665_v9 = vmax.f32 %v572_v59, 0.0  ;;  %v667_v10 = vmax.f32 %v649_v62, 0.0 }
  0xeb   : > { %780 = vmatprep.mubr.f32.mxu0 %v2154_v0  ;;  %869 = vmatprep.mubr.f32.mxu1 %v2154_v0 }
  0xec   : > { %v666_v5 = vmax.f32 %v574_v63, 0.0  ;;  %v668_v6 = vmax.f32 %v651_v1, 0.0 }
  0xee   : > { %1966 = vmatmul.mubr.msk.f32.gmra.mxu0 %vm697_vm1, %v670_v4  ;;  %1970 = vmatmul.mubr.msk.f32.gmra.mxu1 %vm697_vm1, %v670_v4 }
  0xef   : > { %916 = vmatprep.subr.mxu0 %v666_v5  ;;  %1005 = vmatprep.subr.mxu1 %v668_v6 }
  0xf0   : > { %917 = vmatpush1.msra.mxu0 %v665_v9  ;;  %1006 = vmatpush1.msra.mxu1 %v667_v10 }
  0xf1   : > { %918 = vmatprep.subr.mxu0 %v658_v11  ;;  %1007 = vmatprep.subr.mxu1 %v660_v12 }
  0xf2   : > { %786 = vmatprep.mubr.f32.mxu0 %v2154_v0  ;;  %875 = vmatprep.mubr.f32.mxu1 %v2154_v0 }
  0xf3   : > { %919 = vmatpush1.msra.mxu0 %v657_v13  ;;  %1008 = vmatpush1.msra.mxu1 %v659_v14 }
  0xf4   : > { %1967 = vmatmul.mubr.msk.f32.gmra.mxu0 %vm697_vm1, %v671_v15  ;;  %1971 = vmatmul.mubr.msk.f32.gmra.mxu1 %vm697_vm1, %v671_v15 }
  0xf5   : > { %792 = vmatprep.mubr.f32.mxu0 %v2154_v0  ;;  %881 = vmatprep.mubr.f32.mxu1 %v2154_v0 }
  0xf8   : > { %1968 = vmatmul.mubr.msk.f32.gmra.mxu0 %vm697_vm1, %v672_v16  ;;  %1972 = vmatmul.mubr.msk.f32.gmra.mxu1 %vm697_vm1, %v672_v16 }
  0xf9   : > { %952 = vmatprep.mubr.f32.mxu0 %v2154_v0  ;;  %1041 = vmatprep.mubr.f32.mxu1 %v2154_v0 }
  0xfc   : > { %1973 = vmatmul.mubr.msk.f32.vlgmr.msra.gmra.mxu0 %vm697_vm1, %v669_v58  ;;  %1977 = vmatmul.mubr.msk.f32.vlgmr.msra.gmra.mxu1 %vm697_vm1, %v669_v58 }
  0xfd   : > { %958 = vmatprep.mubr.f32.mxu0 %v2154_v0  ;;  %1047 = vmatprep.mubr.f32.mxu1 %v2154_v0 }
 0x100   : > { %1974 = vmatmul.mubr.msk.f32.gmra.mxu0 %vm697_vm1, %v670_v4  ;;  %1978 = vmatmul.mubr.msk.f32.gmra.mxu1 %vm697_vm1, %v670_v4 }
 0x101   : > { %964 = vmatprep.mubr.f32.mxu0 %v2154_v0  ;;  %1053 = vmatprep.mubr.f32.mxu1 %v2154_v0 }
 0x104   : > { %1975 = vmatmul.mubr.msk.f32.gmra.mxu0 %vm697_vm1, %v671_v15  ;;  %1979 = vmatmul.mubr.msk.f32.gmra.mxu1 %vm697_vm1, %v671_v15 }
 0x105   : > { %970 = vmatprep.mubr.f32.mxu0 %v2154_v0  ;;  %1059 = vmatprep.mubr.f32.mxu1 %v2154_v0 }
 0x108   : > { %1976 = vmatmul.mubr.msk.f32.gmra.mxu0 %vm697_vm1, %v672_v16  ;;  %1980 = vmatmul.mubr.msk.f32.gmra.mxu1 %vm697_vm1, %v672_v16  ;;  %v2406_v16 = vld [vmem:[%s2701_s3] sm:$0xff] }
 0x109   : > { %1243 = vmatprep.mubr.f32.mxu0 %v2154_v0  ;;  %1356 = vmatprep.mubr.f32.mxu1 %v2154_v0 }
 0x1aa   : > { %v776_v17 = vpop.f32.mrf.mxu0  ;;  %v865_v18 = vpop.f32.mrf.mxu1 }
 0x1ab   : > { %v777_v61 = vadd.f32 %v776_v17, %v2385_v46  ;;  %v866_v62 = vadd.f32 %v865_v18, %v2385_v46 }
 0x1ac   : > { %v778_v19 = vpop.f32.mrf.mxu0  ;;  %v867_v20 = vpop.f32.mrf.mxu1 }
 0x1ad   : > { %v779_v57 = vadd.f32 %v778_v19, %v2385_v46  ;;  %v868_v58 = vadd.f32 %v867_v20, %v2385_v46  ;;  %v1066_v12 = vmax.f32 %v777_v61, 0.0  ;;  %v1068_v13 = vmax.f32 %v866_v62, 0.0  ;;  %v1105_v61 = vld [vmem:[%s2701_s3 + $0x38] sm:$0xff] }
 0x1ae   : > { %v782_v21 = vpop.f32.mrf.mxu0  ;;  %v871_v22 = vpop.f32.mrf.mxu1 }
 0x1af   : > { %v783_v51 = vadd.f32 %v782_v21, %v2373_v37  ;;  %v872_v52 = vadd.f32 %v871_v22, %v2373_v37  ;;  %v1067_v10 = vmax.f32 %v779_v57, 0.0  ;;  %v1069_v11 = vmax.f32 %v868_v58, 0.0  ;;  %v2417_v21 = vld [vmem:[%s2701_s3 + $0x8] sm:$0xff] }
 0x1b0   : > { %v784_v23 = vpop.f32.mrf.mxu0  ;;  %v873_v24 = vpop.f32.mrf.mxu1 }
 0x1b1   : > { %v785_v47 = vadd.f32 %v784_v23, %v2373_v37  ;;  %v874_v48 = vadd.f32 %v873_v24, %v2373_v37  ;;  %v1074_v6 = vmax.f32 %v783_v51, 0.0  ;;  %v1076_v7 = vmax.f32 %v872_v52, 0.0  ;;  %v1101_v51 = vld [vmem:[%s2701_s3 + $0x18] sm:$0xff] }
 0x1b3   : > { %v1075_v4 = vmax.f32 %v785_v47, 0.0  ;;  %v1077_v5 = vmax.f32 %v874_v48, 0.0 }
 0x1b4   : > { %v788_v26 = vpop.f32.mrf.mxu0  ;;  %v877_v27 = vpop.f32.mrf.mxu1 }
 0x1b5   : > { %v789_v42 = vadd.f32 %v788_v26, %v2369_v30  ;;  %v878_v43 = vadd.f32 %v877_v27, %v2369_v30 }
 0x1b6   : > { %v790_v28 = vpop.f32.mrf.mxu0  ;;  %v879_v29 = vpop.f32.mrf.mxu1 }
 0x1b7   : > { %v791_v38 = vadd.f32 %v790_v28, %v2369_v30  ;;  %v880_v39 = vadd.f32 %v879_v29, %v2369_v30  ;;  %v1082_v63 = vmax.f32 %v789_v42, 0.0  ;;  %v1084_v1 = vmax.f32 %v878_v43, 0.0 }
 0x1b8   : > { %v794_v31 = vpop.f32.mrf.mxu0  ;;  %v883_v32 = vpop.f32.mrf.mxu1 }
 0x1b9   : > { %v795_v33 = vadd.f32 %v794_v31, %v2367_v25  ;;  %v884_v34 = vadd.f32 %v883_v32, %v2367_v25  ;;  %v1083_v59 = vmax.f32 %v791_v38, 0.0  ;;  %v1085_v60 = vmax.f32 %v880_v39, 0.0  ;;  %v2434_v32 = vld [vmem:[%s2701_s3 + $0x10] sm:$0xff] }
 0x1ba   : > { %v796_v35 = vpop.f32.mrf.mxu0  ;;  %v885_v36 = vpop.f32.mrf.mxu1 }
 0x1bb   : > { %v797_v40 = vadd.f32 %v796_v35, %v2367_v25  ;;  %v886_v41 = vadd.f32 %v885_v36, %v2367_v25  ;;  %v1090_v53 = vmax.f32 %v795_v33, 0.0  ;;  %v1092_v54 = vmax.f32 %v884_v34, 0.0 }
 0x1bc   : > { %v2381_v44 = vpop.f32.mrf.mxu0  ;;  %v2383_v45 = vpop.f32.mrf.mxu1 }
 0x1bd   : > { %v1091_v49 = vmax.f32 %v797_v40, 0.0  ;;  %v1093_v50 = vmax.f32 %v886_v41, 0.0  ;;  %v1044_v52 = vadd.f32 %v2383_v45, %v2385_v46  ;;  %v1102_v45 = vld [vmem:[%s2701_s3 + $0x20] sm:$0xff] }
 0x1be   : > { %v2391_v55 = vpop.f32.mrf.mxu0  ;;  %v2393_v56 = vpop.f32.mrf.mxu1 }
 0x1bf   : > { %1203 = vmatprep.subr.mxu0 %v1091_v49  ;;  %1316 = vmatprep.subr.mxu1 %v1093_v50  ;;  %v957_v47 = vadd.f32 %v2391_v55, %v2385_v46  ;;  %v1046_v48 = vadd.f32 %v2393_v56, %v2385_v46 }
 0x1c0   : > { %v2399_v2 = vpop.f32.mrf.mxu0  ;;  %v2401_v3 = vpop.f32.mrf.mxu1  ;;  %1204 = vmatpush1.msra.mxu0 %v1090_v53  ;;  %1317 = vmatpush1.msra.mxu1 %v1092_v54 }
 0x1c1   : > { %1205 = vmatprep.subr.mxu0 %v1083_v59  ;;  %1318 = vmatprep.subr.mxu1 %v1085_v60  ;;  %v961_v43 = vadd.f32 %v2399_v2, %v2373_v37  ;;  %v1071_v57 = vmax.f32 %v957_v47, 0.0  ;;  %v1073_v58 = vmax.f32 %v1046_v48, 0.0  ;;  %v1072_v59 = vmax.f32 %v1044_v52, 0.0  ;;  %v1104_v60 = vld [vmem:[%s2701_s3 + $0x30] sm:$0xff] }
 0x1c2   : > { %v962_v8 = vpop.f32.mrf.mxu0  ;;  %v1051_v9 = vpop.f32.mrf.mxu1  ;;  %1206 = vmatpush1.msra.mxu0 %v1082_v63  ;;  %1319 = vmatpush1.msra.mxu1 %v1084_v1 }
 0x1c3   : > { %1207 = vmatprep.subr.mxu0 %v1075_v4  ;;  %1320 = vmatprep.subr.mxu1 %v1077_v5  ;;  %v963_v39 = vadd.f32 %v962_v8, %v2373_v37  ;;  %v1052_v40 = vadd.f32 %v1051_v9, %v2373_v37  ;;  %v1078_v55 = vmax.f32 %v961_v43, 0.0 }
 0x1c4   : > { %v966_v14 = vpop.f32.mrf.mxu0  ;;  %v1055_v15 = vpop.f32.mrf.mxu1  ;;  %1208 = vmatpush1.msra.mxu0 %v1074_v6  ;;  %1321 = vmatpush1.msra.mxu1 %v1076_v7 }
 0x1c5   : > { %1209 = vmatprep.subr.mxu0 %v1067_v10  ;;  %1322 = vmatprep.subr.mxu1 %v1069_v11  ;;  %v967_v34 = vadd.f32 %v966_v14, %v2369_v30  ;;  %v1056_v35 = vadd.f32 %v1055_v15, %v2369_v30  ;;  %v1079_v53 = vmax.f32 %v963_v39, 0.0  ;;  %v1081_v54 = vmax.f32 %v1052_v40, 0.0  ;;  %v2529_v11 = vpop.permute.xlu0 %1116 }
 0x1c6   : > { %v968_v17 = vpop.f32.mrf.mxu0  ;;  %v1057_v18 = vpop.f32.mrf.mxu1  ;;  %1210 = vmatpush1.msra.mxu0 %v1066_v12  ;;  %1323 = vmatpush1.msra.mxu1 %v1068_v13 }
 0x1c7   : > { %1981 = vmatmul.mubr.msk.f32.vlgmr.msra.gmra.mxu0 %vm1154_vm2, %v2406_v16  ;;  %1989 = vmatmul.mubr.msk.f32.vlgmr.msra.gmra.mxu1 %vm1154_vm2, %v2406_v16  ;;  %v969_v29 = vadd.f32 %v968_v17, %v2369_v30  ;;  %v1058_v31 = vadd.f32 %v1057_v18, %v2369_v30  ;;  %v1050_v30 = vadd.f32 %v2401_v3, %v2373_v37  ;;  %v1086_v49 = vmax.f32 %v967_v34, 0.0  ;;  %v2531_v13 = vpop.permute.xlu1 %1121 }
 0x1c8   : > { %v972_v19 = vpop.f32.mrf.mxu0  ;;  %v1061_v20 = vpop.f32.mrf.mxu1  ;;  %1249 = vmatprep.mubr.f32.mxu0 %v2154_v0  ;;  %1362 = vmatprep.mubr.f32.mxu1 %v2154_v0  ;;  %v1088_v50 = vmax.f32 %v1056_v35, 0.0  ;;  %v955_v37 = vadd.f32 %v2381_v44, %v2385_v46  ;;  %v1103_v46 = vld [vmem:[%s2701_s3 + $0x28] sm:$0xff] }
 0x1c9   : > { %v973_v22 = vadd.f32 %v972_v19, %v2367_v25  ;;  %v1062_v26 = vadd.f32 %v1061_v20, %v2367_v25  ;;  %v1087_v41 = vmax.f32 %v969_v29, 0.0  ;;  %v1089_v42 = vmax.f32 %v1058_v31, 0.0 }
 0x1ca   : > { %v974_v23 = vpop.f32.mrf.mxu0  ;;  %v1063_v24 = vpop.f32.mrf.mxu1  ;;  %v1080_v56 = vmax.f32 %v1050_v30, 0.0  ;;  %v1070_v44 = vmax.f32 %v955_v37, 0.0 }
 0x1cb   : > { %v975_v27 = vadd.f32 %v974_v23, %v2367_v25  ;;  %v1064_v28 = vadd.f32 %v1063_v24, %v2367_v25  ;;  %1982 = vmatmul.mubr.msk.f32.gmra.mxu0 %vm1154_vm2, %v2417_v21  ;;  %1990 = vmatmul.mubr.msk.f32.gmra.mxu1 %vm1154_vm2, %v2417_v21  ;;  %v1094_v36 = vmax.f32 %v973_v22, 0.0  ;;  %v1096_v38 = vmax.f32 %v1062_v26, 0.0  ;;  %v2536_v20 = vpop.permute.xlu1 %1131 }
 0x1cc   : > { %1255 = vmatprep.mubr.f32.mxu0 %v2154_v0  ;;  %1368 = vmatprep.mubr.f32.mxu1 %v2154_v0 }
 0x1cd   : > { %v1095_v25 = vmax.f32 %v975_v27, 0.0  ;;  %v1097_v33 = vmax.f32 %v1064_v28, 0.0 }
 0x1cf   : > { %1983 = vmatmul.mubr.msk.f32.gmra.mxu0 %vm1154_vm2, %v2434_v32  ;;  %1991 = vmatmul.mubr.msk.f32.gmra.mxu1 %vm1154_vm2, %v2434_v32 }
 0x1d0   : > { %1429 = vmatprep.subr.mxu0 %v1095_v25  ;;  %1542 = vmatprep.subr.mxu1 %v1097_v33 }
 0x1d1   : > { %1430 = vmatpush1.msra.mxu0 %v1094_v36  ;;  %1543 = vmatpush1.msra.mxu1 %v1096_v38 }
 0x1d2   : > { %1431 = vmatprep.subr.mxu0 %v1087_v41  ;;  %1544 = vmatprep.subr.mxu1 %v1089_v42 }
 0x1d3   : > { %1261 = vmatprep.mubr.f32.mxu0 %v2154_v0  ;;  %1374 = vmatprep.mubr.f32.mxu1 %v2154_v0 }
 0x1d4   : > { %1432 = vmatpush1.msra.mxu0 %v1086_v49  ;;  %1545 = vmatpush1.msra.mxu1 %v1088_v50 }
 0x1d5   : > { %1984 = vmatmul.mubr.msk.f32.gmra.mxu0 %vm1154_vm2, %v1101_v51  ;;  %1992 = vmatmul.mubr.msk.f32.gmra.mxu1 %vm1154_vm2, %v1101_v51 }
 0x1d6   : > { %1433 = vmatprep.subr.mxu0 %v1079_v53  ;;  %1546 = vmatprep.subr.mxu1 %v1081_v54 }
 0x1d7   : > { %1434 = vmatpush1.msra.mxu0 %v1078_v55  ;;  %1547 = vmatpush1.msra.mxu1 %v1080_v56 }
 0x1d8   : > { %1435 = vmatprep.subr.mxu0 %v1071_v57  ;;  %1548 = vmatprep.subr.mxu1 %v1073_v58 }
 0x1d9   : > { %1267 = vmatprep.mubr.f32.mxu0 %v2154_v0  ;;  %1380 = vmatprep.mubr.f32.mxu1 %v2154_v0 }
 0x1da   : > { %1436 = vmatpush1.msra.mxu0 %v1070_v44  ;;  %1549 = vmatpush1.msra.mxu1 %v1072_v59 }
 0x1db   : > { %1985 = vmatmul.mubr.msk.f32.gmra.mxu0 %vm1154_vm2, %v1102_v45  ;;  %1993 = vmatmul.mubr.msk.f32.gmra.mxu1 %vm1154_vm2, %v1102_v45 }
 0x1dc   : > { %1273 = vmatprep.mubr.f32.mxu0 %v2154_v0  ;;  %1386 = vmatprep.mubr.f32.mxu1 %v2154_v0 }
 0x1df   : > { %1986 = vmatmul.mubr.msk.f32.gmra.mxu0 %vm1154_vm2, %v1103_v46  ;;  %1994 = vmatmul.mubr.msk.f32.gmra.mxu1 %vm1154_vm2, %v1103_v46 }
 0x1e0   : > { %1279 = vmatprep.mubr.f32.mxu0 %v2154_v0  ;;  %1392 = vmatprep.mubr.f32.mxu1 %v2154_v0 }
 0x1e3   : > { %1987 = vmatmul.mubr.msk.f32.gmra.mxu0 %vm1154_vm2, %v1104_v60  ;;  %1995 = vmatmul.mubr.msk.f32.gmra.mxu1 %vm1154_vm2, %v1104_v60 }
 0x1e4   : > { %1285 = vmatprep.mubr.f32.mxu0 %v2154_v0  ;;  %1398 = vmatprep.mubr.f32.mxu1 %v2154_v0 }
 0x1e7   : > { %1988 = vmatmul.mubr.msk.f32.gmra.mxu0 %vm1154_vm2, %v1105_v61  ;;  %1996 = vmatmul.mubr.msk.f32.gmra.mxu1 %vm1154_vm2, %v1105_v61 }
 0x1e8   : > { %1469 = vmatprep.mubr.f32.mxu0 %v2154_v0  ;;  %1582 = vmatprep.mubr.f32.mxu1 %v2154_v0 }
 0x1eb   : > { %1997 = vmatmul.mubr.msk.f32.vlgmr.msra.gmra.mxu0 %vm1154_vm2, %v2406_v16  ;;  %2005 = vmatmul.mubr.msk.f32.vlgmr.msra.gmra.mxu1 %vm1154_vm2, %v2406_v16  ;;  %v2533_v16 = vpop.permute.xlu0 %1126 }
 0x1ec   : > { %1475 = vmatprep.mubr.f32.mxu0 %v2154_v0  ;;  %1588 = vmatprep.mubr.f32.mxu1 %v2154_v0 }
 0x1ef   : > { %1998 = vmatmul.mubr.msk.f32.gmra.mxu0 %vm1154_vm2, %v2417_v21  ;;  %2006 = vmatmul.mubr.msk.f32.gmra.mxu1 %vm1154_vm2, %v2417_v21  ;;  %v2544_v33 = vpop.permute.xlu0 %1136 }
 0x1f0   : > { %1481 = vmatprep.mubr.f32.mxu0 %v2154_v0  ;;  %1594 = vmatprep.mubr.f32.mxu1 %v2154_v0 }
 0x1f3   : > { %1999 = vmatmul.mubr.msk.f32.gmra.mxu0 %vm1154_vm2, %v2434_v32  ;;  %2007 = vmatmul.mubr.msk.f32.gmra.mxu1 %vm1154_vm2, %v2434_v32 }
 0x1f4   : > { %1487 = vmatprep.mubr.f32.mxu0 %v2154_v0  ;;  %1600 = vmatprep.mubr.f32.mxu1 %v2154_v0 }
 0x1f7   : > { %2000 = vmatmul.mubr.msk.f32.gmra.mxu0 %vm1154_vm2, %v1101_v51  ;;  %2008 = vmatmul.mubr.msk.f32.gmra.mxu1 %vm1154_vm2, %v1101_v51 }
 0x1f8   : > { %1493 = vmatprep.mubr.f32.mxu0 %v2154_v0  ;;  %1606 = vmatprep.mubr.f32.mxu1 %v2154_v0 }
 0x1fb   : > { %2001 = vmatmul.mubr.msk.f32.gmra.mxu0 %vm1154_vm2, %v1102_v45  ;;  %2009 = vmatmul.mubr.msk.f32.gmra.mxu1 %vm1154_vm2, %v1102_v45 }
 0x1fc   : > { %1499 = vmatprep.mubr.f32.mxu0 %v2154_v0  ;;  %1612 = vmatprep.mubr.f32.mxu1 %v2154_v0 }
 0x1ff   : > { %2002 = vmatmul.mubr.msk.f32.gmra.mxu0 %vm1154_vm2, %v1103_v46  ;;  %2010 = vmatmul.mubr.msk.f32.gmra.mxu1 %vm1154_vm2, %v1103_v46 }
 0x200   : > { %1505 = vmatprep.mubr.f32.mxu0 %v2154_v0  ;;  %1618 = vmatprep.mubr.f32.mxu1 %v2154_v0 }
 0x203   : > { %2003 = vmatmul.mubr.msk.f32.gmra.mxu0 %vm1154_vm2, %v1104_v60  ;;  %2011 = vmatmul.mubr.msk.f32.gmra.mxu1 %vm1154_vm2, %v1104_v60 }
 0x204   : > { %1511 = vmatprep.mubr.f32.mxu0 %v2154_v0  ;;  %1624 = vmatprep.mubr.f32.mxu1 %v2154_v0 }
 0x207   : > { %2004 = vmatmul.mubr.msk.f32.gmra.mxu0 %vm1154_vm2, %v1105_v61  ;;  %2012 = vmatmul.mubr.msk.f32.gmra.mxu1 %vm1154_vm2, %v1105_v61 }
 0x287   : > { %v1245_v62 = vpop.f32.mrf.mxu0  ;;  %v1358_v63 = vpop.f32.mrf.mxu1 }
 0x288   : > { %v1246_v21 = vadd.f32 %v1245_v62, %v2529_v11  ;;  %v1359_v35 = vadd.f32 %v1358_v63, %v2529_v11 }
 0x289   : > { %v1247_v1 = vpop.f32.mrf.mxu0  ;;  %v1360_v2 = vpop.f32.mrf.mxu1 }
 0x28a   : > { %v1248_v17 = vadd.f32 %v1247_v1, %v2529_v11  ;;  %v1631_v34 = vmax.f32 %v1246_v21, 0.0  ;;  %v1633_v53 = vmax.f32 %v1359_v35, 0.0  ;;  %v1361_v57 = vadd.f32 %v1360_v2, %v2529_v11 }
 0x28b   : > { %v1251_v3 = vpop.f32.mrf.mxu0  ;;  %v1364_v4 = vpop.f32.mrf.mxu1 }
 0x28c   : > { %v1632_v27 = vmax.f32 %v1248_v17, 0.0  ;;  %v1252_v28 = vadd.f32 %v1251_v3, %v2531_v13  ;;  %v1365_v47 = vadd.f32 %v1364_v4, %v2531_v13 }
 0x28d   : > { %v1253_v5 = vpop.f32.mrf.mxu0  ;;  %v1366_v6 = vpop.f32.mrf.mxu1 }
 0x28e   : > { %v1254_v22 = vadd.f32 %v1253_v5, %v2531_v13  ;;  %v1711_v43 = vmax.f32 %v1631_v34, %v1632_v27  ;;  %v1639_v30 = vmax.f32 %v1252_v28, 0.0  ;;  %v1641_v60 = vmax.f32 %v1365_v47, 0.0 }
 0x28f   : > { %v1257_v7 = vpop.f32.mrf.mxu0  ;;  %v1370_v8 = vpop.f32.mrf.mxu1  ;;  %v1367_v61 = vadd.f32 %v1366_v6, %v2531_v13 }
 0x290   : > { %v1258_v31 = vadd.f32 %v1257_v7, %v2533_v16  ;;  %v1640_v36 = vmax.f32 %v1254_v22, 0.0  ;;  %v1371_v50 = vadd.f32 %v1370_v8, %v2533_v16  ;;  %v1719_v46 = vmax.f32 %v1711_v43, %v1633_v53  ;;  %v2565_v7 = vpop.permute.xlu1 %1141 }
 0x291   : > { %v1259_v9 = vpop.f32.mrf.mxu0  ;;  %v1372_v10 = vpop.f32.mrf.mxu1 }
 0x292   : > { %v1260_v23 = vadd.f32 %v1259_v9, %v2533_v16  ;;  %v1647_v49 = vmax.f32 %v1258_v31, 0.0  ;;  %v1712_v54 = vmax.f32 %v1639_v30, %v1640_v36  ;;  %v1649_v63 = vmax.f32 %v1371_v50, 0.0  ;;  %v2580_v30 = vpop.permute.xlu0 %1146 }
 0x293   : > { %v1373_v1 = vadd.f32 %v1372_v10, %v2533_v16  ;;  %v1642_v10 = vmax.f32 %v1367_v61, 0.0 }
 0x294   : > { %v1648_v39 = vmax.f32 %v1260_v23, 0.0  ;;  %v1720_v8 = vmax.f32 %v1712_v54, %v1641_v60 }
 0x295   : > { %v1263_v12 = vpop.f32.mrf.mxu0  ;;  %v1376_v0 = vpop.f32.mrf.mxu1  ;;  %v1650_v23 = vmax.f32 %v1373_v1, 0.0 }
 0x296   : > { %v1264_v38 = vadd.f32 %v1263_v12, %v2536_v20  ;;  %v1377_v56 = vadd.f32 %v1376_v0, %v2536_v20  ;;  %v1713_v58 = vmax.f32 %v1647_v49, %v1648_v39  ;;  %v1634_v0 = vmax.f32 %v1361_v57, 0.0 }
 0x297   : > { %v1265_v14 = vpop.f32.mrf.mxu0  ;;  %v1378_v15 = vpop.f32.mrf.mxu1  ;;  %v1728_v31 = vmax.f32 %v1720_v8, %v1642_v10 }
 0x298   : > { %v1266_v29 = vadd.f32 %v1265_v14, %v2536_v20  ;;  %v1655_v55 = vmax.f32 %v1264_v38, 0.0  ;;  %v1657_v9 = vmax.f32 %v1377_v56, 0.0  ;;  %v1379_v12 = vadd.f32 %v1378_v15, %v2536_v20 }
 0x299   : > { %v1721_v14 = vmax.f32 %v1713_v58, %v1649_v63  ;;  %v1727_v22 = vmax.f32 %v1719_v46, %v1634_v0 }
 0x29a   : > { %v1656_v48 = vmax.f32 %v1266_v29, 0.0  ;;  %v1658_v15 = vmax.f32 %v1379_v12, 0.0 }
 0x29b   : > { %v1269_v18 = vpop.f32.mrf.mxu0  ;;  %v1382_v19 = vpop.f32.mrf.mxu1  ;;  %v1729_v36 = vmax.f32 %v1721_v14, %v1650_v23 }
 0x29c   : > { %v1270_v51 = vadd.f32 %v1269_v18, %v2544_v33  ;;  %v1714_v62 = vmax.f32 %v1655_v55, %v1656_v48  ;;  %v1383_v4 = vadd.f32 %v1382_v19, %v2544_v33 }
 0x29d   : > { %v1271_v24 = vpop.f32.mrf.mxu0  ;;  %v1384_v26 = vpop.f32.mrf.mxu1 }
 0x29e   : > { %v1272_v40 = vadd.f32 %v1271_v24, %v2544_v33  ;;  %v1663_v3 = vmax.f32 %v1270_v51, 0.0  ;;  %v1722_v21 = vmax.f32 %v1714_v62, %v1657_v9  ;;  %v1665_v24 = vmax.f32 %v1383_v4, 0.0 }
 0x29f   : > { %v1275_v32 = vpop.f32.mrf.mxu0  ;;  %v1388_v25 = vpop.f32.mrf.mxu1  ;;  %v1385_v27 = vadd.f32 %v1384_v26, %v2544_v33 }
 0x2a0   : > { %v1664_v44 = vmax.f32 %v1272_v40, 0.0  ;;  %v1276_v34 = vadd.f32 %v1275_v32, %v2565_v7  ;;  %v1389_v39 = vadd.f32 %v1388_v25, %v2565_v7  ;;  %v2582_v26 = vmax.f32 %v1722_v21, %v1658_v15 }
 0x2a1   : > { %v1277_v41 = vpop.f32.mrf.mxu0  ;;  %v1390_v42 = vpop.f32.mrf.mxu1  ;;  %v1666_v32 = vmax.f32 %v1385_v27, 0.0 }
 0x2a2   : > { %v1715_v6 = vmax.f32 %v1663_v3, %v1664_v44  ;;  %v1278_v19 = vadd.f32 %v1277_v41, %v2565_v7  ;;  %v2578_v40 = vadd.f32 %v1390_v42, %v2565_v7  ;;  %v1671_v54 = vmax.f32 %v1276_v34, 0.0 }
 0x2a3   : > { %v1281_v37 = vpop.f32.mrf.mxu0  ;;  %v1394_v52 = vpop.f32.mrf.mxu1  ;;  %v1673_v44 = vmax.f32 %v1389_v39, 0.0 }
 0x2a4   : > { %v1723_v38 = vmax.f32 %v1715_v6, %v1665_v24  ;;  %v1672_v47 = vmax.f32 %v1278_v19, 0.0  ;;  %v2586_v50 = vadd.f32 %v1281_v37, %v2580_v30  ;;  %v2589_v51 = vadd.f32 %v1394_v52, %v2580_v30 }
 0x2a5   : > { %v2554_v59 = vpop.f32.mrf.mxu0  ;;  %v2556_v45 = vpop.f32.mrf.mxu1  ;;  %v1674_v46 = vmax.f32 %v2578_v40, 0.0 }
 0x2a6   : > { %v2593_v58 = vmax.f32 %v1723_v38, %v1666_v32  ;;  %v1716_v52 = vmax.f32 %v1671_v54, %v1672_v47  ;;  %v1679_v3 = vmax.f32 %v2586_v50, 0.0  ;;  %v1681_v4 = vmax.f32 %v2589_v51, 0.0 }
 0x2a7   : > { %v2561_v5 = vpop.f32.mrf.mxu0  ;;  %v2563_v2 = vpop.f32.mrf.mxu1  ;;  %v1284_v14 = vadd.f32 %v2554_v59, %v2580_v30  ;;  %v2606_v21 = vadd.f32 %v2556_v45, %v2580_v30 }
 0x2a9   : > { %v2568_v17 = vpop.f32.mrf.mxu0  ;;  %v2570_v18 = vpop.f32.mrf.mxu1 }
 0x2ab   : > { %v1471_v28 = vpop.f32.mrf.mxu0  ;;  %v1584_v29 = vpop.f32.mrf.mxu1 }
 0x2ac   : > { %v1472_v35 = vadd.f32 %v1471_v28, %v2529_v11  ;;  %v1585_v25 = vadd.f32 %v1584_v29, %v2529_v11  ;;  %v2609_v28 = vpop.permute.xlu1 %1151  ;;  %v1724_v29 = vmax.f32 %v1716_v52, %v1673_v44 }
 0x2ad   : > { %v1473_v41 = vpop.f32.mrf.mxu0  ;;  %v1586_v43 = vpop.f32.mrf.mxu1 }
 0x2ae   : > { %v1635_v48 = vmax.f32 %v1472_v35, 0.0  ;;  %v1474_v49 = vadd.f32 %v1473_v41, %v2529_v11  ;;  %v1587_v37 = vadd.f32 %v1586_v43, %v2529_v11  ;;  %v1637_v8 = vmax.f32 %v1585_v25, 0.0 }
 0x2af   : > { %v1477_v42 = vpop.f32.mrf.mxu0  ;;  %v1590_v53 = vpop.f32.mrf.mxu1 }
 0x2b0   : > { %v1735_v55 = vmax.f32 %v1727_v22, %v1635_v48  ;;  %v1636_v56 = vmax.f32 %v1474_v49, 0.0  ;;  %v1478_v57 = vadd.f32 %v1477_v42, %v2531_v13  ;;  %v1591_v9 = vadd.f32 %v1590_v53, %v2531_v13 }
 0x2b1   : > { %v1479_v60 = vpop.f32.mrf.mxu0  ;;  %v1592_v61 = vpop.f32.mrf.mxu1  ;;  %v1638_v19 = vmax.f32 %v1587_v37, 0.0  ;;  %v1401_v49 = vadd.f32 %v2563_v2, %v2609_v28  ;;  %v1680_v53 = vmax.f32 %v1284_v14, 0.0 }
 0x2b2   : > { %v1743_v62 = vmax.f32 %v1735_v55, %v1636_v56  ;;  %v1643_v63 = vmax.f32 %v1478_v57, 0.0  ;;  %v1480_v1 = vadd.f32 %v1479_v60, %v2531_v13  ;;  %v1593_v22 = vadd.f32 %v1592_v61, %v2531_v13 }
 0x2b3   : > { %v1483_v12 = vpop.f32.mrf.mxu0  ;;  %v1596_v0 = vpop.f32.mrf.mxu1  ;;  %v1645_v35 = vmax.f32 %v1591_v9, 0.0  ;;  %v1290_v13 = vadd.f32 %v2568_v17, %v2609_v28  ;;  %v1682_v17 = vmax.f32 %v2606_v21, 0.0 }
 0x2b4   : > { %v1736_v11 = vmax.f32 %v1728_v31, %v1643_v63  ;;  %v1644_v6 = vmax.f32 %v1480_v1, 0.0  ;;  %v1484_v10 = vadd.f32 %v1483_v12, %v2533_v16  ;;  %v1751_v27 = vmax.f32 %v1743_v62, %v1637_v8 }
 0x2b5   : > { %v1485_v23 = vpop.f32.mrf.mxu0  ;;  %v1598_v24 = vpop.f32.mrf.mxu1  ;;  %v1288_v31 = vadd.f32 %v2561_v5, %v2609_v28  ;;  %v1597_v45 = vadd.f32 %v1596_v0, %v2533_v16  ;;  %v1646_v32 = vmax.f32 %v1593_v22, 0.0  ;;  %v1688_v60 = vmax.f32 %v1290_v13, 0.0 }
 0x2b6   : > { %v1744_v15 = vmax.f32 %v1736_v11, %v1644_v6  ;;  %v1651_v34 = vmax.f32 %v1484_v10, 0.0  ;;  %v1486_v59 = vadd.f32 %v1485_v23, %v2533_v16  ;;  %v1759_v41 = vmax.f32 %v1751_v27, %v1638_v19 }
 0x2b7   : > { %v1489_v38 = vpop.f32.mrf.mxu0  ;;  %v1602_v39 = vpop.f32.mrf.mxu1  ;;  %v1599_v50 = vadd.f32 %v1598_v24, %v2533_v16  ;;  %v1687_v62 = vmax.f32 %v1288_v31, 0.0  ;;  %v1717_v0 = vmax.f32 %v1679_v3, %v1680_v53  ;;  %v1732_v10 = vmax.f32 %v1724_v29, %v1674_v46 }
 0x2b8   : > { %v1737_v43 = vmax.f32 %v1729_v36, %v1651_v34  ;;  %v1652_v47 = vmax.f32 %v1486_v59, 0.0  ;;  %v1490_v48 = vadd.f32 %v1489_v38, %v2536_v20  ;;  %1786 = vmax.xlane.f32.xlu0 %v1759_v41  ;;  %v1752_v42 = vmax.f32 %v1744_v15, %v1645_v35 }
 0x2b9   : > { %v1491_v5 = vpop.f32.mrf.mxu0  ;;  %v1604_v25 = vpop.f32.mrf.mxu1  ;;  %v1653_v36 = vmax.f32 %v1597_v45, 0.0  ;;  %v1603_v57 = vadd.f32 %v1602_v39, %v2536_v20  ;;  %v1654_v63 = vmax.f32 %v1599_v50, 0.0  ;;  %v1718_v24 = vmax.f32 %v1687_v62, %v1688_v60 }
 0x2ba   : > { %v1745_v54 = vmax.f32 %v1737_v43, %v1652_v47  ;;  %v1659_v55 = vmax.f32 %v1490_v48, 0.0  ;;  %v1492_v56 = vadd.f32 %v1491_v5, %v2536_v20  ;;  %v1760_v2 = vmax.f32 %v1752_v42, %v1646_v32 }
 0x2bb   : > { %v1495_v44 = vpop.f32.mrf.mxu0  ;;  %v1608_v37 = vpop.f32.mrf.mxu1  ;;  %v1605_v1 = vadd.f32 %v1604_v25, %v2536_v20  ;;  %v1689_v3 = vmax.f32 %v1401_v49, 0.0  ;;  %v1725_v29 = vmax.f32 %v1717_v0, %v1681_v4 }
 0x2bc   : > { %v1738_v16 = vmax.f32 %v2582_v26, %v1659_v55  ;;  %v1660_v61 = vmax.f32 %v1492_v56, 0.0  ;;  %v1496_v52 = vadd.f32 %v1495_v44, %v2544_v33  ;;  %1788 = vmax.xlane.f32.xlu1 %v1760_v2  ;;  %v1753_v12 = vmax.f32 %v1745_v54, %v1653_v36 }
 0x2bd   : > { %v1497_v8 = vpop.f32.mrf.mxu0  ;;  %v1610_v9 = vpop.f32.mrf.mxu1  ;;  %v1661_v26 = vmax.f32 %v1603_v57, 0.0  ;;  %v1609_v21 = vadd.f32 %v1608_v37, %v2544_v33  ;;  %v1662_v34 = vmax.f32 %v1605_v1, 0.0  ;;  %v1726_v47 = vmax.f32 %v1718_v24, %v1689_v3 }
 0x2be   : > { %v1746_v14 = vmax.f32 %v1738_v16, %v1660_v61  ;;  %v1667_v11 = vmax.f32 %v1496_v52, 0.0  ;;  %v1498_v6 = vadd.f32 %v1497_v8, %v2544_v33  ;;  %v1761_v23 = vmax.f32 %v1753_v12, %v1654_v63 }
 0x2bf   : > { %v1501_v19 = vpop.f32.mrf.mxu0  ;;  %v1614_v22 = vpop.f32.mrf.mxu1  ;;  %v1611_v59 = vadd.f32 %v1610_v9, %v2544_v33  ;;  %v1669_v39 = vmax.f32 %v1609_v21, 0.0  ;;  %v1733_v42 = vmax.f32 %v1725_v29, %v1682_v17 }
 0x2c0   : > { %v1739_v20 = vmax.f32 %v2593_v58, %v1667_v11  ;;  %v1668_v27 = vmax.f32 %v1498_v6, 0.0  ;;  %v1502_v15 = vadd.f32 %v1501_v19, %v2565_v7  ;;  %1790 = vmax.xlane.f32.xlu0 %v1761_v23  ;;  %v1754_v46 = vmax.f32 %v1746_v14, %v1661_v26 }
 0x2c1   : > { %v1503_v31 = vpop.f32.mrf.mxu0  ;;  %v1616_v40 = vpop.f32.mrf.mxu1  ;;  %v1403_v58 = vadd.f32 %v2570_v18, %v2609_v28  ;;  %v1615_v41 = vadd.f32 %v1614_v22, %v2565_v7  ;;  %v1670_v51 = vmax.f32 %v1611_v59, 0.0 }
 0x2c2   : > { %v1747_v35 = vmax.f32 %v1739_v20, %v1668_v27  ;;  %v1675_v45 = vmax.f32 %v1502_v15, 0.0  ;;  %v1504_v38 = vadd.f32 %v1503_v31, %v2565_v7  ;;  %v1762_v33 = vmax.f32 %v1754_v46, %v1662_v34 }
 0x2c3   : > { %v1507_v13 = vpop.f32.mrf.mxu0  ;;  %v1620_v43 = vpop.f32.mrf.mxu1  ;;  %v1617_v4 = vadd.f32 %v1616_v40, %v2565_v7  ;;  %v1690_v56 = vmax.f32 %v1403_v58, 0.0  ;;  %v1677_v36 = vmax.f32 %v1615_v41, 0.0  ;;  %v1810_v27 = vlaneseq }
 0x2c4   : > { %v1740_v48 = vmax.f32 %v1732_v10, %v1675_v45  ;;  %v1676_v49 = vmax.f32 %v1504_v38, 0.0  ;;  %v1508_v32 = vadd.f32 %v1507_v13, %v2580_v30  ;;  %v1621_v50 = vadd.f32 %v1620_v43, %v2580_v30  ;;  %1792 = vmax.xlane.f32.xlu0 %v1762_v33 }
 0x2c5   : > { %v1509_v5 = vpop.f32.mrf.mxu0  ;;  %v1622_v25 = vpop.f32.mrf.mxu1  ;;  %v1755_v18 = vmax.f32 %v1747_v35, %v1669_v39  ;;  %v1734_v61 = vmax.f32 %v1726_v47, %v1690_v56  ;;  %v1678_v52 = vmax.f32 %v1617_v4, 0.0  ;;  %v1811_v3 = vand.u32 127, %v1810_v27 }
 0x2c6   : > { %v1748_v53 = vmax.f32 %v1740_v48, %v1676_v49  ;;  %v1683_v54 = vmax.f32 %v1508_v32, 0.0  ;;  %v1510_v55 = vadd.f32 %v1509_v5, %v2580_v30  ;;  %v1623_v57 = vadd.f32 %v1622_v25, %v2580_v30 }
 0x2c7   : > { %v1513_v44 = vpop.f32.mrf.mxu0  ;;  %v1626_v37 = vpop.f32.mrf.mxu1  ;;  %v1763_v2 = vmax.f32 %v1755_v18, %v1670_v51  ;;  %v1685_v62 = vmax.f32 %v1621_v50, 0.0  ;;  %v1816_v59 = vadd.s32 4294967288, %v1811_v3  ;;  %v1823_v31 = vadd.s32 4294967280, %v1811_v3 }
 0x2c8   : > { %v1741_v60 = vmax.f32 %v1733_v42, %v1683_v54  ;;  %v1684_v7 = vmax.f32 %v1510_v55, 0.0  ;;  %v1514_v16 = vadd.f32 %v1513_v44, %v2609_v28  ;;  %v1756_v1 = vmax.f32 %v1748_v53, %v1677_v36 }
 0x2c9   : > { %1794 = vmax.xlane.f32.xlu1 %v1763_v2  ;;  %v1515_v17 = vpop.f32.mrf.mxu0  ;;  %v1628_v63 = vpop.f32.mrf.mxu1  ;;  %v1627_v12 = vadd.f32 %v1626_v37, %v2609_v28  ;;  %v1686_v0 = vmax.f32 %v1623_v57, 0.0  ;;  %v1813_v40 = vshrl.u32 %v1810_v27, 7  ;;  %v1830_v46 = vadd.s32 4294967272, %v1811_v3 }
 0x2ca   : > { %v1749_v8 = vmax.f32 %v1741_v60, %v1684_v7  ;;  %v1691_v9 = vmax.f32 %v1514_v16, 0.0  ;;  %v1516_v30 = vadd.f32 %v1515_v17, %v2609_v28  ;;  %v1764_v14 = vmax.f32 %v1756_v1, %v1678_v52 }
 0x2cb   : > { %v1629_v10 = vadd.f32 %v1628_v63, %v2609_v28  ;;  %v1693_v21 = vmax.f32 %v1627_v12, 0.0  ;;  %v1837_v29 = vadd.s32 4294967264, %v1811_v3  ;;  %v1819_v35 = vsub.s32 %v1816_v59, %v1813_v40 }
 0x2cc   : > { %v1742_v11 = vmax.f32 %v1734_v61, %v1691_v9  ;;  %v1692_v6 = vmax.f32 %v1516_v30, 0.0  ;;  %v1757_v26 = vmax.f32 %v1749_v8, %v1685_v62  ;;  %1796 = vmax.xlane.f32.xlu0 %v1764_v14  ;;  %v1844_v45 = vadd.s32 4294967256, %v1811_v3 }
 0x2cd   : > { %v1694_v23 = vmax.f32 %v1629_v10, 0.0  ;;  %v1826_v38 = vsub.s32 %v1823_v31, %v1813_v40  ;;  %v1851_v39 = vadd.s32 4294967248, %v1811_v3  ;;  %v1814_v41 = vsub.s32 %v1811_v3, %v1813_v40 }
 0x2ce   : > { %v1750_v19 = vmax.f32 %v1742_v11, %v1692_v6  ;;  %v1765_v22 = vmax.f32 %v1757_v26, %v1686_v0  ;;  %v1833_v13 = vsub.s32 %v1830_v46, %v1813_v40  ;;  %v1840_v43 = vsub.s32 %v1837_v29, %v1813_v40 }
 0x2cf   : > { %v1847_v48 = vsub.s32 %v1844_v45, %v1813_v40  ;;  %v1858_v49 = vadd.s32 4294967240, %v1811_v3  ;;  %v1854_v4 = vsub.s32 %v1851_v39, %v1813_v40 }
 0x2d0   : > { %1798 = vmax.xlane.f32.xlu1 %v1765_v22  ;;  %v1758_v24 = vmax.f32 %v1750_v19, %v1693_v21 }
 0x2d1   : > { %v1861_v54 = vsub.s32 %v1858_v49, %v1813_v40 }
 0x2d2   : > { %v1766_v20 = vmax.f32 %v1758_v24, %v1694_v23 }
 0x2d4   : > { %1800 = vmax.xlane.f32.xlu0 %v1766_v20 }
 0x341   : > { %v1787_v15 = vpop.xlane.xlu0 %1786 }
 0x342   : > { %v1815_v50 = vrot.slane %v1787_v15, %v1814_v41 }
 0x345   : > { %v1789_v28 = vpop.xlane.xlu1 %1788 }
 0x346   : > { %v1820_v47 = vrot.slane %v1789_v28, %v1819_v35 }
 0x348   : > { %v1822_v42 = vsel %vm1821_vm3, %v1820_v47, %v1815_v50 }
 0x349   : > { %v1791_v34 = vpop.xlane.xlu0 %1790 }
 0x34a   : > { %v1827_v32 = vrot.slane %v1791_v34, %v1826_v38 }
 0x34c   : > { %v1829_v55 = vsel %vm1828_vm4, %v1827_v32, %v1822_v42 }
 0x34d   : > { %v1793_v58 = vpop.xlane.xlu0 %1792 }
 0x34e   : > { %v1834_v5 = vrot.slane %v1793_v58, %v1833_v13 }
 0x350   : > { %v1836_v36 = vsel %vm1835_vm5, %v1834_v5, %v1829_v55 }
 0x352   : > { %v1795_v33 = vpop.xlane.xlu1 %1794 }
 0x353   : > { %v1841_v25 = vrot.slane %v1795_v33, %v1840_v43 }
 0x355   : > { %v1797_v51 = vpop.xlane.xlu0 %1796  ;;  %v1843_v57 = vsel %vm1842_vm6, %v1841_v25, %v1836_v36 }
 0x356   : > { %v1848_v53 = vrot.slane %v1797_v51, %v1847_v48 }
 0x358   : > { %v1850_v37 = vsel %vm1849_vm7, %v1848_v53, %v1843_v57 }
 0x359   : > { %v1799_v18 = vpop.xlane.xlu1 %1798 }
 0x35a   : > { %v1855_v56 = vrot.slane %v1799_v18, %v1854_v4 }
 0x35c   : > { %v1857_v60 = vsel %vm1856_vm8, %v1855_v56, %v1850_v37 }
 0x35d   : > { %v1801_v44 = vpop.xlane.xlu0 %1800 }
 0x35e   : > { %v1862_v2 = vrot.slane %v1801_v44, %v1861_v54 }
 0x360   : > { %v1864_v7 = vsel %vm1863_vm9, %v1862_v2, %v1857_v60 }
 0x361   : > { %1867 = vst.msk [vmem:[%s293_s10] sm:$0x1] %vm1866_vm10, %v1864_v7 }
 0x362   : > { %2089 = shalt.err (!%p2086_p5)
}
 0x363   : > { %s2090_s22 = scalar_lea.hbm %s2656_s17, 16  ;;  %s2094_s8 = scalar_lea.hbm %s2705_s7, 32 }
 0x364   : > { %p2091_p6 = scmp.ne.s32.totalorder %s2656_s17, %s2090_s22  ;;  %p2095_p10 = scmp.lt.s32.totalorder %s2656_s17, %s2705_s7 }
 0x365   : > { %p2096_p11 = scmp.lt.s32.totalorder %s2094_s8, %s2090_s22 }
 0x366   : > { %p2092_p7 = pnand %p2091_p6, %p2237_p4 }
 0x367   : > { %p2097_p12 = por %p2096_p11, %p2095_p10 }
 0x368   : > { %p2093_p9 = pneg %p2092_p7 }
 0x36a   : > { %p2098_p13 = pnand %p2097_p12, %p2093_p9 }
 0x36c   : > { %2101 = shalt.err (!%p2098_p13)
}
 0x36d   : > { %2017 = dma.vmem_to_hbm [thread:$0]  (%p2237_p4), %s1882_s12, 16, %s2656_s17, %s1869_s27  }
 0x36e PF: > { %p2023_p0 = scmp.ge.s32.totalorder %s2152_s29, 2  ;;  %s1893_s16 = sand.u32 1, %s2132_s24  }
 0x36f   : > { %s1894_s18 = scalar_lea.sflag [#allocation4], %s1893_s16 }
 0x370   : > { %p2020_p1 = pnand %p2023_p0, %p2244_p8 }
 0x372   : > { %p2021_p2 = pneg %p2020_p1 }
 0x374   : > { %2127 = dma.done.wait (%p2021_p2), %s1894_s18, 16  }
 0x375   : > { %2129 = vsyncadd (%p2021_p2), %s1894_s18, 4294967280  ;;  %s20_s29 = sadd.s32 1, %s2152_s29   ;;  %s2708_s24 = smov %s2136_s25 }
 0x376   : > { %p17_p3 = scmp.ge.s32.totalorder %s20_s29, 4   ;;  %s2709_s25 = smov %s2140_s26 }
 0x377   : > { %s2710_s26 = smov %s2250_s14  ;;  %s2711_s27 = smov %s2148_s28 }
 0x378   : > { %s2712_s28 = smov %s2714_s9  ;;  %19 = sbr.rel (!%p17_p3) target bundleno = 4 (0x4), region = 91 }
 0x37d   :  { %1898 = vsyncpa [#allocation4], 1 }
 0x37e   :  { %1900 = vsyncpa [#allocation4 + $0x1], 1 }

// kernel: tpu_custom_call.1
= control target key start
LH: loop header
LB: loop body
LE: loop exit
PB: predicated region body
PF: predicated region fallthrough
CT: control target
= control target key end

     0   :  { %12 = vsyncpa [#allocation4], 0  ;;  %s2698_s0 = inlined_call_operand.vmem [shape: f32[2,8,1024], index: 0, kind: input, shape index: {}]   ;;  %s2699_s1 = inlined_call_operand.vmem [shape: f32[16,8], index: 1, kind: input, shape index: {}]   ;;  %s2700_s2 = inlined_call_operand.vmem [shape: f32[32,16], index: 2, kind: input, shape index: {}]   ;;  %s2701_s3 = inlined_call_operand.vmem [shape: f32[64,32], index: 3, kind: input, shape index: {}]   ;;  %s2702_s4 = inlined_call_operand.vmem [shape: f32[16,1], index: 4, kind: input, shape index: {}]   ;;  %s2703_s5 = inlined_call_operand.vmem [shape: f32[32,1], index: 5, kind: input, shape index: {}]   ;;  %s2704_s6 = inlined_call_operand.vmem [shape: f32[64,1], index: 6, kind: input, shape index: {}]   ;;  %s2705_s7 = inlined_call_operand.hbm [shape: f32[2,1,64], index: 7, kind: output, shape index: {}]  }
   0x1   :  { %14 = vsyncpa [#allocation4 + $0x1], 0  ;;  %s2197_s24 = smov 0   ;;  %s2199_s25 = smov 0  }
   0x2   :  { %s2201_s26 = smov 0   ;;  %s2203_s27 = smov 0  }
   0x3   :  { %s2205_s28 = smov 0   ;;  %s2207_s29 = smov 0  }
   0x4 LB: > { %s1950_s30 = sadd.s32 4294967295, %s2152_s29   ;;  %s1951_s8 = sadd.s32 4294967294, %s2152_s29   ;;  %s2152_s29 = sphi %s2207_s29, %s20_s29   ;;  %s2148_s28 = sphi %s2205_s28, %s2712_s28   ;;  %s2144_s27 = sphi %s2203_s27, %s2711_s27   ;;  %s2140_s26 = sphi %s2201_s26, %s2710_s26   ;;  %s2136_s25 = sphi %s2199_s25, %s2709_s25   ;;  %s2132_s24 = sphi %s2197_s24, %s2708_s24  }
   0x5   : > { %s32_s9 = sadd.s32 1, %s2148_s28  ;;  %s193_s10 = sadd.s32 1, %s2140_s26 }
   0x6   : > { %p34_p0 = scmp.ge.s32.totalorder %s32_s9, 2  ;;  %p203_p1 = scmp.ne.s32.totalorder %s2140_s26, %s2136_s25 }
   0x7   : > { %p204_p2 = scmp.eq.s32.totalorder %s1950_s30, 1  ;;  %p209_p3 = scmp.ne.s32.totalorder %s2136_s25, %s2132_s24 }
   0x8   : > { %s2714_s9 = smov (%p34_p0, %s32_s9), 0  ;;  %p210_p5 = scmp.eq.s32.totalorder %s1951_s8, 1 }
   0x9   : > { %p2237_p4 = por %p204_p2, %p203_p1  ;;  %s190_s12 = ssub.s32 %s2148_s28, %s2714_s9 }
   0xa   : > { %p1954_p6 = scmp.ge.s32.totalorder %s2152_s29, 1  ;;  %p191_p7 = scmp.eq.s32.totalorder %s190_s12, 0 }
   0xb   : > { %p2244_p8 = por %p210_p5, %p209_p3  ;;  %p259_p9 = scmp.lt.s32.totalorder %s2152_s29, 3 }
   0xc   : > { %s2250_s14 = scalar_select %p191_p7, %s2140_s26, %s193_s10  }
   0xd   : > { %p260_p10 = pnand %p1954_p6, %p259_p9 }
   0xe   : > { %p295_p11 = scmp.lt.s32.totalorder (!%p260_p10), %s2144_s27, 1  ;;  %s292_s30 = sand.u32 (!%p260_p10), 1, %s2136_s25  }
   0xf   : > { %263 = sbr.rel (%p260_p10) target bundleno = 878 (0x36e), region = 48  ;;  %s2013_s8 = sshll.u32 (!%p260_p10), %s2144_s27, 4 }
  0x10   : > { %s293_s10 = scalar_lea.vmem (!%p260_p10), [#allocation3], %s292_s30  ;;  %s2156_s19 = smov (!%p260_p10), [#allocation3]  }
  0x11   : > { %s1881_s12 = sshll.u32 (!%p260_p10), %s293_s10, 4  ;;  %s2080_s20 = sshll.u32 (!%p260_p10), %s2156_s19, 4  ;;  %s1882_s12 = int_to_ptr.vmem [resolvable:$true] %s1881_s12  ;;  %s2081_s20 = int_to_ptr.vmem [resolvable:$false] %s2080_s20 }
  0x12   : > { %p2083_p1 = scmp.lt.s32.totalorder (!%p260_p10), %s1882_s12, %s2081_s20 }
  0x14   : > { %v2154_v0 = vmov 0.0   ;;  %v327_v1 = vld [vmem:[%s2702_s4 + $0x8] sm:$0xff]  ;;  %s296_s17 = scalar_select %p295_p11, %s2144_s27, 1  ;;  %v2155_v2 = vmov 0   ;;  %v324_v3 = vld [vmem:[%s2699_s1] sm:$0xff]  ;;  %vm338_vm0 = vcmask 64512  }
  0x15   : > { %409 = vmatprep.mubr.f32.mxu0 %v2154_v0  ;;  %486 = vmatprep.mubr.f32.mxu1 %v2154_v0  ;;  %v325_v12 = vld [vmem:[%s2699_s1 + $0x8] sm:$0xff]  ;;  %v326_v13 = vld [vmem:[%s2702_s4] sm:$0xff]  ;;  %v1108_v16 = vld [vmem:[%s2704_s6 + $0x10] sm:$0xff]  ;;  %vm697_vm1 = vcmask 130048   ;;  %vm1154_vm2 = vcmask 261120   ;;  %vm1821_vm3 = vcmask 130112  }
  0x16   : > { %2074 = vset.pattern.permute.xlu0 %v2155_v2  ;;  %2075 = vset.pattern.permute.xlu1 %v2155_v2  ;;  %s2016_s18 = sshll.u32 %s296_s17, 6  ;;  %v674_v14 = vld [vmem:[%s2703_s5 + $0x8] sm:$0xff]  ;;  %v1106_v15 = vld [vmem:[%s2704_s6] sm:$0xff]  ;;  %v1112_v18 = vld [vmem:[%s2704_s6 + $0x30] sm:$0xff]  ;;  %vm1828_vm4 = vcmask 195712   ;;  %vm1835_vm5 = vcmask 261312   ;;  %s2656_s17 = scalar_lea.hbm %s2705_s7, %s2013_s8 }
  0x17   : > { %335 = vperm.xlu0 %2074, %v327_v1   ;;  %s302_s21 = scalar_lea.vmem %s2698_s0, %s2016_s18  ;;  %v1110_v17 = vld [vmem:[%s2704_s6 + $0x20] sm:$0xff]  ;;  %v676_v19 = vld [vmem:[%s2703_s5 + $0x18] sm:$0xff]  ;;  %v675_v20 = vld [vmem:[%s2703_s5 + $0x10] sm:$0xff]  ;;  %vm1842_vm6 = vcmask 326912   ;;  %vm1849_vm7 = vcmask 392512   ;;  %vm1856_vm8 = vcmask 458112  }
  0x18   : > { %v317_v4 = vld [vmem:[%s302_s21 + $0x8] sm:$0xff]  ;;  %v319_v5 = vld [vmem:[%s302_s21 + $0x18] sm:$0xff]  ;;  %v316_v6 = vld [vmem:[%s302_s21] sm:$0xff]  ;;  %694 = vperm.xlu1 %2075, %v676_v19   ;;  %vm1863_vm9 = vcmask 523712   ;;  %vm1866_vm10 = vcmask 516096   ;;  %s1869_s27 = scalar_lea.sflag [#allocation4], %s292_s30 }
  0x19   : > { %375 = vmatprep.subr.mxu0 %v317_v4  ;;  %452 = vmatprep.subr.mxu1 %v319_v5  ;;  %v318_v7 = vld [vmem:[%s302_s21 + $0x10] sm:$0xff]  ;;  %v321_v8 = vld [vmem:[%s302_s21 + $0x28] sm:$0xff]  ;;  %v323_v9 = vld [vmem:[%s302_s21 + $0x38] sm:$0xff]  ;;  %s2076_s18 = scalar_lea.vmem %s1882_s12, 16 }
  0x1a   : > { %376 = vmatpush1.msra.mxu0 %v316_v6  ;;  %453 = vmatpush1.msra.mxu1 %v318_v7  ;;  %v320_v10 = vld [vmem:[%s302_s21 + $0x20] sm:$0xff]  ;;  %v322_v11 = vld [vmem:[%s302_s21 + $0x30] sm:$0xff]  ;;  %v1107_v22 = vld [vmem:[%s2704_s6 + $0x8] sm:$0xff]  ;;  %p2077_p12 = scmp.ne.s32.totalorder %s1882_s12, %s2076_s18  ;;  %s2082_s21 = scalar_lea.vmem %s2081_s20, 32 }
  0x1b   : > { %1957 = vmatmul.mubr.msk.f32.vlgmr.msra.gmra.mxu0 %vm338_vm0, %v324_v3  ;;  %1959 = vmatmul.mubr.msk.f32.vlgmr.msra.gmra.mxu1 %vm338_vm0, %v324_v3  ;;  %v673_v21 = vld [vmem:[%s2703_s5] sm:$0xff]  ;;  %v1109_v23 = vld [vmem:[%s2704_s6 + $0x18] sm:$0xff]  ;;  %v1111_v24 = vld [vmem:[%s2704_s6 + $0x28] sm:$0xff]  ;;  %p2084_p2 = scmp.lt.s32.totalorder %s2082_s21, %s2076_s18 }
  0x1c   : > { %415 = vmatprep.mubr.f32.mxu0 %v2154_v0  ;;  %492 = vmatprep.mubr.f32.mxu1 %v2154_v0  ;;  %v1113_v25 = vld [vmem:[%s2704_s6 + $0x38] sm:$0xff]  ;;  %v669_v58 = vld [vmem:[%s2700_s2] sm:$0xff]  ;;  %v670_v4 = vld [vmem:[%s2700_s2 + $0x8] sm:$0xff]  ;;  %p2078_p13 = pnand %p2077_p12, %p2237_p4 }
  0x1d   : > { %529 = vmatprep.subr.mxu0 %v321_v8  ;;  %606 = vmatprep.subr.mxu1 %v323_v9  ;;  %p2085_p3 = por %p2084_p2, %p2083_p1 }
  0x1e   : > { %530 = vmatpush1.msra.mxu0 %v320_v10  ;;  %607 = vmatpush1.msra.mxu1 %v322_v11  ;;  %p2079_p0 = pneg %p2078_p13 }
  0x1f   : > { %1958 = vmatmul.mubr.msk.f32.gmra.mxu0 %vm338_vm0, %v325_v12  ;;  %1960 = vmatmul.mubr.msk.f32.gmra.mxu1 %vm338_vm0, %v325_v12 }
  0x20   : > { %563 = vmatprep.mubr.f32.mxu0 %v2154_v0  ;;  %640 = vmatprep.mubr.f32.mxu1 %v2154_v0  ;;  %p2086_p5 = pnand %p2085_p3, %p2079_p0 }
  0x21   : > { %330 = vperm.xlu0 %2074, %v326_v13   ;;  %689 = vperm.xlu1 %2075, %v675_v20  }
  0x23   : > { %1961 = vmatmul.mubr.msk.f32.vlgmr.msra.gmra.mxu0 %vm338_vm0, %v324_v3  ;;  %1963 = vmatmul.mubr.msk.f32.vlgmr.msra.gmra.mxu1 %vm338_vm0, %v324_v3 }
  0x24   : > { %569 = vmatprep.mubr.f32.mxu0 %v2154_v0  ;;  %646 = vmatprep.mubr.f32.mxu1 %v2154_v0 }
  0x25   : > { %684 = vperm.xlu0 %2074, %v674_v14   ;;  %679 = vperm.xlu1 %2075, %v673_v21  }
  0x27   : > { %1962 = vmatmul.mubr.msk.f32.gmra.mxu0 %vm338_vm0, %v325_v12  ;;  %1964 = vmatmul.mubr.msk.f32.gmra.mxu1 %vm338_vm0, %v325_v12 }
  0x28   : > { %774 = vmatprep.mubr.f32.mxu0 %v2154_v0  ;;  %863 = vmatprep.mubr.f32.mxu1 %v2154_v0 }
  0x29   : > { %1116 = vperm.xlu0 %2074, %v1106_v15   ;;  %1121 = vperm.xlu1 %2075, %v1107_v22   ;;  %v671_v15 = vld [vmem:[%s2700_s2 + $0x10] sm:$0xff] }
  0x2d   : > { %1126 = vperm.xlu0 %2074, %v1108_v16   ;;  %1131 = vperm.xlu1 %2075, %v1109_v23   ;;  %v672_v16 = vld [vmem:[%s2700_s2 + $0x18] sm:$0xff] }
  0x31   : > { %1136 = vperm.xlu0 %2074, %v1110_v17   ;;  %1141 = vperm.xlu1 %2075, %v1111_v24  }
  0x35   : > { %1146 = vperm.xlu0 %2074, %v1112_v18   ;;  %1151 = vperm.xlu1 %2075, %v1113_v25  }
  0x92   : > { %v336_v26 = vpop.permute.xlu0 %335 }
  0x93   : > { %v2367_v25 = vpop.permute.xlu1 %694 }
  0x9c   : > { %v331_v33 = vpop.permute.xlu0 %330 }
  0xdb   : > { %v411_v27 = vpop.f32.mrf.mxu0  ;;  %v488_v28 = vpop.f32.mrf.mxu1 }
  0xdc   : > { %v412_v42 = vadd.f32 %v411_v27, %v331_v33  ;;  %v489_v43 = vadd.f32 %v488_v28, %v331_v33 }
  0xdd   : > { %v413_v29 = vpop.f32.mrf.mxu0  ;;  %v490_v30 = vpop.f32.mrf.mxu1 }
  0xde   : > { %v414_v38 = vadd.f32 %v413_v29, %v331_v33  ;;  %v491_v39 = vadd.f32 %v490_v30, %v331_v33  ;;  %v653_v54 = vmax.f32 %v412_v42, 0.0  ;;  %v655_v55 = vmax.f32 %v489_v43, 0.0  ;;  %v2369_v30 = vpop.permute.xlu1 %689 }
  0xdf   : > { %v417_v31 = vpop.f32.mrf.mxu0  ;;  %v494_v32 = vpop.f32.mrf.mxu1 }
  0xe0   : > { %v418_v34 = vadd.f32 %v417_v31, %v336_v26  ;;  %v495_v35 = vadd.f32 %v494_v32, %v336_v26  ;;  %v654_v52 = vmax.f32 %v414_v38, 0.0  ;;  %v656_v53 = vmax.f32 %v491_v39, 0.0 }
  0xe1   : > { %v419_v36 = vpop.f32.mrf.mxu0  ;;  %v496_v37 = vpop.f32.mrf.mxu1 }
  0xe2   : > { %v420_v40 = vadd.f32 %v419_v36, %v336_v26  ;;  %v497_v41 = vadd.f32 %v496_v37, %v336_v26  ;;  %v661_v48 = vmax.f32 %v418_v34, 0.0  ;;  %v663_v49 = vmax.f32 %v495_v35, 0.0  ;;  %v2373_v37 = vpop.permute.xlu0 %684 }
  0xe3   : > { %v565_v44 = vpop.f32.mrf.mxu0  ;;  %v642_v45 = vpop.f32.mrf.mxu1 }
  0xe4   : > { %v662_v46 = vmax.f32 %v420_v40, 0.0  ;;  %v664_v47 = vmax.f32 %v497_v41, 0.0  ;;  %v566_v7 = vadd.f32 %v565_v44, %v331_v33  ;;  %v643_v8 = vadd.f32 %v642_v45, %v331_v33 }
  0xe5   : > { %v567_v50 = vpop.f32.mrf.mxu0  ;;  %v644_v51 = vpop.f32.mrf.mxu1 }
  0xe6   : > { %738 = vmatprep.subr.mxu0 %v662_v46  ;;  %827 = vmatprep.subr.mxu1 %v664_v47  ;;  %v568_v2 = vadd.f32 %v567_v50, %v331_v33  ;;  %v645_v3 = vadd.f32 %v644_v51, %v331_v33  ;;  %v657_v13 = vmax.f32 %v566_v7, 0.0  ;;  %v659_v14 = vmax.f32 %v643_v8, 0.0  ;;  %v2385_v46 = vpop.permute.xlu1 %679 }
  0xe7   : > { %v571_v56 = vpop.f32.mrf.mxu0  ;;  %v648_v57 = vpop.f32.mrf.mxu1  ;;  %739 = vmatpush1.msra.mxu0 %v661_v48  ;;  %828 = vmatpush1.msra.mxu1 %v663_v49 }
  0xe8   : > { %740 = vmatprep.subr.mxu0 %v654_v52  ;;  %829 = vmatprep.subr.mxu1 %v656_v53  ;;  %v572_v59 = vadd.f32 %v571_v56, %v336_v26  ;;  %v649_v62 = vadd.f32 %v648_v57, %v336_v26  ;;  %v658_v11 = vmax.f32 %v568_v2, 0.0  ;;  %v660_v12 = vmax.f32 %v645_v3, 0.0 }
  0xe9   : > { %v573_v60 = vpop.f32.mrf.mxu0  ;;  %v650_v61 = vpop.f32.mrf.mxu1  ;;  %741 = vmatpush1.msra.mxu0 %v653_v54  ;;  %830 = vmatpush1.msra.mxu1 %v655_v55 }
  0xea   : > { %v574_v63 = vadd.f32 %v573_v60, %v336_v26  ;;  %v651_v1 = vadd.f32 %v650_v61, %v336_v26  ;;  %1965 = vmatmul.mubr.msk.f32.vlgmr.msra.gmra.mxu0 %vm697_vm1, %v669_v58  ;;  %1969 = vmatmul.mubr.msk.f32.vlgmr.msra.gmra.mxu1 %vm697_vm1, %v669_v58  ;;  %v665_v9 = vmax.f32 %v572_v59, 0.0  ;;  %v667_v10 = vmax.f32 %v649_v62, 0.0 }
  0xeb   : > { %780 = vmatprep.mubr.f32.mxu0 %v2154_v0  ;;  %869 = vmatprep.mubr.f32.mxu1 %v2154_v0 }
  0xec   : > { %v666_v5 = vmax.f32 %v574_v63, 0.0  ;;  %v668_v6 = vmax.f32 %v651_v1, 0.0 }
  0xee   : > { %1966 = vmatmul.mubr.msk.f32.gmra.mxu0 %vm697_vm1, %v670_v4  ;;  %1970 = vmatmul.mubr.msk.f32.gmra.mxu1 %vm697_vm1, %v670_v4 }
  0xef   : > { %916 = vmatprep.subr.mxu0 %v666_v5  ;;  %1005 = vmatprep.subr.mxu1 %v668_v6 }
  0xf0   : > { %917 = vmatpush1.msra.mxu0 %v665_v9  ;;  %1006 = vmatpush1.msra.mxu1 %v667_v10 }
  0xf1   : > { %918 = vmatprep.subr.mxu0 %v658_v11  ;;  %1007 = vmatprep.subr.mxu1 %v660_v12 }
  0xf2   : > { %786 = vmatprep.mubr.f32.mxu0 %v2154_v0  ;;  %875 = vmatprep.mubr.f32.mxu1 %v2154_v0 }
  0xf3   : > { %919 = vmatpush1.msra.mxu0 %v657_v13  ;;  %1008 = vmatpush1.msra.mxu1 %v659_v14 }
  0xf4   : > { %1967 = vmatmul.mubr.msk.f32.gmra.mxu0 %vm697_vm1, %v671_v15  ;;  %1971 = vmatmul.mubr.msk.f32.gmra.mxu1 %vm697_vm1, %v671_v15 }
  0xf5   : > { %792 = vmatprep.mubr.f32.mxu0 %v2154_v0  ;;  %881 = vmatprep.mubr.f32.mxu1 %v2154_v0 }
  0xf8   : > { %1968 = vmatmul.mubr.msk.f32.gmra.mxu0 %vm697_vm1, %v672_v16  ;;  %1972 = vmatmul.mubr.msk.f32.gmra.mxu1 %vm697_vm1, %v672_v16 }
  0xf9   : > { %952 = vmatprep.mubr.f32.mxu0 %v2154_v0  ;;  %1041 = vmatprep.mubr.f32.mxu1 %v2154_v0 }
  0xfc   : > { %1973 = vmatmul.mubr.msk.f32.vlgmr.msra.gmra.mxu0 %vm697_vm1, %v669_v58  ;;  %1977 = vmatmul.mubr.msk.f32.vlgmr.msra.gmra.mxu1 %vm697_vm1, %v669_v58 }
  0xfd   : > { %958 = vmatprep.mubr.f32.mxu0 %v2154_v0  ;;  %1047 = vmatprep.mubr.f32.mxu1 %v2154_v0 }
 0x100   : > { %1974 = vmatmul.mubr.msk.f32.gmra.mxu0 %vm697_vm1, %v670_v4  ;;  %1978 = vmatmul.mubr.msk.f32.gmra.mxu1 %vm697_vm1, %v670_v4 }
 0x101   : > { %964 = vmatprep.mubr.f32.mxu0 %v2154_v0  ;;  %1053 = vmatprep.mubr.f32.mxu1 %v2154_v0 }
 0x104   : > { %1975 = vmatmul.mubr.msk.f32.gmra.mxu0 %vm697_vm1, %v671_v15  ;;  %1979 = vmatmul.mubr.msk.f32.gmra.mxu1 %vm697_vm1, %v671_v15 }
 0x105   : > { %970 = vmatprep.mubr.f32.mxu0 %v2154_v0  ;;  %1059 = vmatprep.mubr.f32.mxu1 %v2154_v0 }
 0x108   : > { %1976 = vmatmul.mubr.msk.f32.gmra.mxu0 %vm697_vm1, %v672_v16  ;;  %1980 = vmatmul.mubr.msk.f32.gmra.mxu1 %vm697_vm1, %v672_v16  ;;  %v2406_v16 = vld [vmem:[%s2701_s3] sm:$0xff] }
 0x109   : > { %1243 = vmatprep.mubr.f32.mxu0 %v2154_v0  ;;  %1356 = vmatprep.mubr.f32.mxu1 %v2154_v0 }
 0x1aa   : > { %v776_v17 = vpop.f32.mrf.mxu0  ;;  %v865_v18 = vpop.f32.mrf.mxu1 }
 0x1ab   : > { %v777_v61 = vadd.f32 %v776_v17, %v2385_v46  ;;  %v866_v62 = vadd.f32 %v865_v18, %v2385_v46 }
 0x1ac   : > { %v778_v19 = vpop.f32.mrf.mxu0  ;;  %v867_v20 = vpop.f32.mrf.mxu1 }
 0x1ad   : > { %v779_v57 = vadd.f32 %v778_v19, %v2385_v46  ;;  %v868_v58 = vadd.f32 %v867_v20, %v2385_v46  ;;  %v1066_v12 = vmax.f32 %v777_v61, 0.0  ;;  %v1068_v13 = vmax.f32 %v866_v62, 0.0  ;;  %v1105_v61 = vld [vmem:[%s2701_s3 + $0x38] sm:$0xff] }
 0x1ae   : > { %v782_v21 = vpop.f32.mrf.mxu0  ;;  %v871_v22 = vpop.f32.mrf.mxu1 }
 0x1af   : > { %v783_v51 = vadd.f32 %v782_v21, %v2373_v37  ;;  %v872_v52 = vadd.f32 %v871_v22, %v2373_v37  ;;  %v1067_v10 = vmax.f32 %v779_v57, 0.0  ;;  %v1069_v11 = vmax.f32 %v868_v58, 0.0  ;;  %v2417_v21 = vld [vmem:[%s2701_s3 + $0x8] sm:$0xff] }
 0x1b0   : > { %v784_v23 = vpop.f32.mrf.mxu0  ;;  %v873_v24 = vpop.f32.mrf.mxu1 }
 0x1b1   : > { %v785_v47 = vadd.f32 %v784_v23, %v2373_v37  ;;  %v874_v48 = vadd.f32 %v873_v24, %v2373_v37  ;;  %v1074_v6 = vmax.f32 %v783_v51, 0.0  ;;  %v1076_v7 = vmax.f32 %v872_v52, 0.0  ;;  %v1101_v51 = vld [vmem:[%s2701_s3 + $0x18] sm:$0xff] }
 0x1b3   : > { %v1075_v4 = vmax.f32 %v785_v47, 0.0  ;;  %v1077_v5 = vmax.f32 %v874_v48, 0.0 }
 0x1b4   : > { %v788_v26 = vpop.f32.mrf.mxu0  ;;  %v877_v27 = vpop.f32.mrf.mxu1 }
 0x1b5   : > { %v789_v42 = vadd.f32 %v788_v26, %v2369_v30  ;;  %v878_v43 = vadd.f32 %v877_v27, %v2369_v30 }
 0x1b6   : > { %v790_v28 = vpop.f32.mrf.mxu0  ;;  %v879_v29 = vpop.f32.mrf.mxu1 }
 0x1b7   : > { %v791_v38 = vadd.f32 %v790_v28, %v2369_v30  ;;  %v880_v39 = vadd.f32 %v879_v29, %v2369_v30  ;;  %v1082_v63 = vmax.f32 %v789_v42, 0.0  ;;  %v1084_v1 = vmax.f32 %v878_v43, 0.0 }
 0x1b8   : > { %v794_v31 = vpop.f32.mrf.mxu0  ;;  %v883_v32 = vpop.f32.mrf.mxu1 }
 0x1b9   : > { %v795_v33 = vadd.f32 %v794_v31, %v2367_v25  ;;  %v884_v34 = vadd.f32 %v883_v32, %v2367_v25  ;;  %v1083_v59 = vmax.f32 %v791_v38, 0.0  ;;  %v1085_v60 = vmax.f32 %v880_v39, 0.0  ;;  %v2434_v32 = vld [vmem:[%s2701_s3 + $0x10] sm:$0xff] }
 0x1ba   : > { %v796_v35 = vpop.f32.mrf.mxu0  ;;  %v885_v36 = vpop.f32.mrf.mxu1 }
 0x1bb   : > { %v797_v40 = vadd.f32 %v796_v35, %v2367_v25  ;;  %v886_v41 = vadd.f32 %v885_v36, %v2367_v25  ;;  %v1090_v53 = vmax.f32 %v795_v33, 0.0  ;;  %v1092_v54 = vmax.f32 %v884_v34, 0.0 }
 0x1bc   : > { %v2381_v44 = vpop.f32.mrf.mxu0  ;;  %v2383_v45 = vpop.f32.mrf.mxu1 }
 0x1bd   : > { %v1091_v49 = vmax.f32 %v797_v40, 0.0  ;;  %v1093_v50 = vmax.f32 %v886_v41, 0.0  ;;  %v1044_v52 = vadd.f32 %v2383_v45, %v2385_v46  ;;  %v1102_v45 = vld [vmem:[%s2701_s3 + $0x20] sm:$0xff] }
 0x1be   : > { %v2391_v55 = vpop.f32.mrf.mxu0  ;;  %v2393_v56 = vpop.f32.mrf.mxu1 }
 0x1bf   : > { %1203 = vmatprep.subr.mxu0 %v1091_v49  ;;  %1316 = vmatprep.subr.mxu1 %v1093_v50  ;;  %v957_v47 = vadd.f32 %v2391_v55, %v2385_v46  ;;  %v1046_v48 = vadd.f32 %v2393_v56, %v2385_v46 }
 0x1c0   : > { %v2399_v2 = vpop.f32.mrf.mxu0  ;;  %v2401_v3 = vpop.f32.mrf.mxu1  ;;  %1204 = vmatpush1.msra.mxu0 %v1090_v53  ;;  %1317 = vmatpush1.msra.mxu1 %v1092_v54 }
 0x1c1   : > { %1205 = vmatprep.subr.mxu0 %v1083_v59  ;;  %1318 = vmatprep.subr.mxu1 %v1085_v60  ;;  %v961_v43 = vadd.f32 %v2399_v2, %v2373_v37  ;;  %v1071_v57 = vmax.f32 %v957_v47, 0.0  ;;  %v1073_v58 = vmax.f32 %v1046_v48, 0.0  ;;  %v1072_v59 = vmax.f32 %v1044_v52, 0.0  ;;  %v1104_v60 = vld [vmem:[%s2701_s3 + $0x30] sm:$0xff] }
 0x1c2   : > { %v962_v8 = vpop.f32.mrf.mxu0  ;;  %v1051_v9 = vpop.f32.mrf.mxu1  ;;  %1206 = vmatpush1.msra.mxu0 %v1082_v63  ;;  %1319 = vmatpush1.msra.mxu1 %v1084_v1 }
 0x1c3   : > { %1207 = vmatprep.subr.mxu0 %v1075_v4  ;;  %1320 = vmatprep.subr.mxu1 %v1077_v5  ;;  %v963_v39 = vadd.f32 %v962_v8, %v2373_v37  ;;  %v1052_v40 = vadd.f32 %v1051_v9, %v2373_v37  ;;  %v1078_v55 = vmax.f32 %v961_v43, 0.0 }
 0x1c4   : > { %v966_v14 = vpop.f32.mrf.mxu0  ;;  %v1055_v15 = vpop.f32.mrf.mxu1  ;;  %1208 = vmatpush1.msra.mxu0 %v1074_v6  ;;  %1321 = vmatpush1.msra.mxu1 %v1076_v7 }
 0x1c5   : > { %1209 = vmatprep.subr.mxu0 %v1067_v10  ;;  %1322 = vmatprep.subr.mxu1 %v1069_v11  ;;  %v967_v34 = vadd.f32 %v966_v14, %v2369_v30  ;;  %v1056_v35 = vadd.f32 %v1055_v15, %v2369_v30  ;;  %v1079_v53 = vmax.f32 %v963_v39, 0.0  ;;  %v1081_v54 = vmax.f32 %v1052_v40, 0.0  ;;  %v2529_v11 = vpop.permute.xlu0 %1116 }
 0x1c6   : > { %v968_v17 = vpop.f32.mrf.mxu0  ;;  %v1057_v18 = vpop.f32.mrf.mxu1  ;;  %1210 = vmatpush1.msra.mxu0 %v1066_v12  ;;  %1323 = vmatpush1.msra.mxu1 %v1068_v13 }
 0x1c7   : > { %1981 = vmatmul.mubr.msk.f32.vlgmr.msra.gmra.mxu0 %vm1154_vm2, %v2406_v16  ;;  %1989 = vmatmul.mubr.msk.f32.vlgmr.msra.gmra.mxu1 %vm1154_vm2, %v2406_v16  ;;  %v969_v29 = vadd.f32 %v968_v17, %v2369_v30  ;;  %v1058_v31 = vadd.f32 %v1057_v18, %v2369_v30  ;;  %v1050_v30 = vadd.f32 %v2401_v3, %v2373_v37  ;;  %v1086_v49 = vmax.f32 %v967_v34, 0.0  ;;  %v2531_v13 = vpop.permute.xlu1 %1121 }
 0x1c8   : > { %v972_v19 = vpop.f32.mrf.mxu0  ;;  %v1061_v20 = vpop.f32.mrf.mxu1  ;;  %1249 = vmatprep.mubr.f32.mxu0 %v2154_v0  ;;  %1362 = vmatprep.mubr.f32.mxu1 %v2154_v0  ;;  %v1088_v50 = vmax.f32 %v1056_v35, 0.0  ;;  %v955_v37 = vadd.f32 %v2381_v44, %v2385_v46  ;;  %v1103_v46 = vld [vmem:[%s2701_s3 + $0x28] sm:$0xff] }
 0x1c9   : > { %v973_v22 = vadd.f32 %v972_v19, %v2367_v25  ;;  %v1062_v26 = vadd.f32 %v1061_v20, %v2367_v25  ;;  %v1087_v41 = vmax.f32 %v969_v29, 0.0  ;;  %v1089_v42 = vmax.f32 %v1058_v31, 0.0 }
 0x1ca   : > { %v974_v23 = vpop.f32.mrf.mxu0  ;;  %v1063_v24 = vpop.f32.mrf.mxu1  ;;  %v1080_v56 = vmax.f32 %v1050_v30, 0.0  ;;  %v1070_v44 = vmax.f32 %v955_v37, 0.0 }
 0x1cb   : > { %v975_v27 = vadd.f32 %v974_v23, %v2367_v25  ;;  %v1064_v28 = vadd.f32 %v1063_v24, %v2367_v25  ;;  %1982 = vmatmul.mubr.msk.f32.gmra.mxu0 %vm1154_vm2, %v2417_v21  ;;  %1990 = vmatmul.mubr.msk.f32.gmra.mxu1 %vm1154_vm2, %v2417_v21  ;;  %v1094_v36 = vmax.f32 %v973_v22, 0.0  ;;  %v1096_v38 = vmax.f32 %v1062_v26, 0.0  ;;  %v2536_v20 = vpop.permute.xlu1 %1131 }
 0x1cc   : > { %1255 = vmatprep.mubr.f32.mxu0 %v2154_v0  ;;  %1368 = vmatprep.mubr.f32.mxu1 %v2154_v0 }
 0x1cd   : > { %v1095_v25 = vmax.f32 %v975_v27, 0.0  ;;  %v1097_v33 = vmax.f32 %v1064_v28, 0.0 }
 0x1cf   : > { %1983 = vmatmul.mubr.msk.f32.gmra.mxu0 %vm1154_vm2, %v2434_v32  ;;  %1991 = vmatmul.mubr.msk.f32.gmra.mxu1 %vm1154_vm2, %v2434_v32 }
 0x1d0   : > { %1429 = vmatprep.subr.mxu0 %v1095_v25  ;;  %1542 = vmatprep.subr.mxu1 %v1097_v33 }
 0x1d1   : > { %1430 = vmatpush1.msra.mxu0 %v1094_v36  ;;  %1543 = vmatpush1.msra.mxu1 %v1096_v38 }
 0x1d2   : > { %1431 = vmatprep.subr.mxu0 %v1087_v41  ;;  %1544 = vmatprep.subr.mxu1 %v1089_v42 }
 0x1d3   : > { %1261 = vmatprep.mubr.f32.mxu0 %v2154_v0  ;;  %1374 = vmatprep.mubr.f32.mxu1 %v2154_v0 }
 0x1d4   : > { %1432 = vmatpush1.msra.mxu0 %v1086_v49  ;;  %1545 = vmatpush1.msra.mxu1 %v1088_v50 }
 0x1d5   : > { %1984 = vmatmul.mubr.msk.f32.gmra.mxu0 %vm1154_vm2, %v1101_v51  ;;  %1992 = vmatmul.mubr.msk.f32.gmra.mxu1 %vm1154_vm2, %v1101_v51 }
 0x1d6   : > { %1433 = vmatprep.subr.mxu0 %v1079_v53  ;;  %1546 = vmatprep.subr.mxu1 %v1081_v54 }
 0x1d7   : > { %1434 = vmatpush1.msra.mxu0 %v1078_v55  ;;  %1547 = vmatpush1.msra.mxu1 %v1080_v56 }
 0x1d8   : > { %1435 = vmatprep.subr.mxu0 %v1071_v57  ;;  %1548 = vmatprep.subr.mxu1 %v1073_v58 }
 0x1d9   : > { %1267 = vmatprep.mubr.f32.mxu0 %v2154_v0  ;;  %1380 = vmatprep.mubr.f32.mxu1 %v2154_v0 }
 0x1da   : > { %1436 = vmatpush1.msra.mxu0 %v1070_v44  ;;  %1549 = vmatpush1.msra.mxu1 %v1072_v59 }
 0x1db   : > { %1985 = vmatmul.mubr.msk.f32.gmra.mxu0 %vm1154_vm2, %v1102_v45  ;;  %1993 = vmatmul.mubr.msk.f32.gmra.mxu1 %vm1154_vm2, %v1102_v45 }
 0x1dc   : > { %1273 = vmatprep.mubr.f32.mxu0 %v2154_v0  ;;  %1386 = vmatprep.mubr.f32.mxu1 %v2154_v0 }
 0x1df   : > { %1986 = vmatmul.mubr.msk.f32.gmra.mxu0 %vm1154_vm2, %v1103_v46  ;;  %1994 = vmatmul.mubr.msk.f32.gmra.mxu1 %vm1154_vm2, %v1103_v46 }
 0x1e0   : > { %1279 = vmatprep.mubr.f32.mxu0 %v2154_v0  ;;  %1392 = vmatprep.mubr.f32.mxu1 %v2154_v0 }
 0x1e3   : > { %1987 = vmatmul.mubr.msk.f32.gmra.mxu0 %vm1154_vm2, %v1104_v60  ;;  %1995 = vmatmul.mubr.msk.f32.gmra.mxu1 %vm1154_vm2, %v1104_v60 }
 0x1e4   : > { %1285 = vmatprep.mubr.f32.mxu0 %v2154_v0  ;;  %1398 = vmatprep.mubr.f32.mxu1 %v2154_v0 }
 0x1e7   : > { %1988 = vmatmul.mubr.msk.f32.gmra.mxu0 %vm1154_vm2, %v1105_v61  ;;  %1996 = vmatmul.mubr.msk.f32.gmra.mxu1 %vm1154_vm2, %v1105_v61 }
 0x1e8   : > { %1469 = vmatprep.mubr.f32.mxu0 %v2154_v0  ;;  %1582 = vmatprep.mubr.f32.mxu1 %v2154_v0 }
 0x1eb   : > { %1997 = vmatmul.mubr.msk.f32.vlgmr.msra.gmra.mxu0 %vm1154_vm2, %v2406_v16  ;;  %2005 = vmatmul.mubr.msk.f32.vlgmr.msra.gmra.mxu1 %vm1154_vm2, %v2406_v16  ;;  %v2533_v16 = vpop.permute.xlu0 %1126 }
 0x1ec   : > { %1475 = vmatprep.mubr.f32.mxu0 %v2154_v0  ;;  %1588 = vmatprep.mubr.f32.mxu1 %v2154_v0 }
 0x1ef   : > { %1998 = vmatmul.mubr.msk.f32.gmra.mxu0 %vm1154_vm2, %v2417_v21  ;;  %2006 = vmatmul.mubr.msk.f32.gmra.mxu1 %vm1154_vm2, %v2417_v21  ;;  %v2544_v33 = vpop.permute.xlu0 %1136 }
 0x1f0   : > { %1481 = vmatprep.mubr.f32.mxu0 %v2154_v0  ;;  %1594 = vmatprep.mubr.f32.mxu1 %v2154_v0 }
 0x1f3   : > { %1999 = vmatmul.mubr.msk.f32.gmra.mxu0 %vm1154_vm2, %v2434_v32  ;;  %2007 = vmatmul.mubr.msk.f32.gmra.mxu1 %vm1154_vm2, %v2434_v32 }
 0x1f4   : > { %1487 = vmatprep.mubr.f32.mxu0 %v2154_v0  ;;  %1600 = vmatprep.mubr.f32.mxu1 %v2154_v0 }
 0x1f7   : > { %2000 = vmatmul.mubr.msk.f32.gmra.mxu0 %vm1154_vm2, %v1101_v51  ;;  %2008 = vmatmul.mubr.msk.f32.gmra.mxu1 %vm1154_vm2, %v1101_v51 }
 0x1f8   : > { %1493 = vmatprep.mubr.f32.mxu0 %v2154_v0  ;;  %1606 = vmatprep.mubr.f32.mxu1 %v2154_v0 }
 0x1fb   : > { %2001 = vmatmul.mubr.msk.f32.gmra.mxu0 %vm1154_vm2, %v1102_v45  ;;  %2009 = vmatmul.mubr.msk.f32.gmra.mxu1 %vm1154_vm2, %v1102_v45 }
 0x1fc   : > { %1499 = vmatprep.mubr.f32.mxu0 %v2154_v0  ;;  %1612 = vmatprep.mubr.f32.mxu1 %v2154_v0 }
 0x1ff   : > { %2002 = vmatmul.mubr.msk.f32.gmra.mxu0 %vm1154_vm2, %v1103_v46  ;;  %2010 = vmatmul.mubr.msk.f32.gmra.mxu1 %vm1154_vm2, %v1103_v46 }
 0x200   : > { %1505 = vmatprep.mubr.f32.mxu0 %v2154_v0  ;;  %1618 = vmatprep.mubr.f32.mxu1 %v2154_v0 }
 0x203   : > { %2003 = vmatmul.mubr.msk.f32.gmra.mxu0 %vm1154_vm2, %v1104_v60  ;;  %2011 = vmatmul.mubr.msk.f32.gmra.mxu1 %vm1154_vm2, %v1104_v60 }
 0x204   : > { %1511 = vmatprep.mubr.f32.mxu0 %v2154_v0  ;;  %1624 = vmatprep.mubr.f32.mxu1 %v2154_v0 }
 0x207   : > { %2004 = vmatmul.mubr.msk.f32.gmra.mxu0 %vm1154_vm2, %v1105_v61  ;;  %2012 = vmatmul.mubr.msk.f32.gmra.mxu1 %vm1154_vm2, %v1105_v61 }
 0x287   : > { %v1245_v62 = vpop.f32.mrf.mxu0  ;;  %v1358_v63 = vpop.f32.mrf.mxu1 }
 0x288   : > { %v1246_v21 = vadd.f32 %v1245_v62, %v2529_v11  ;;  %v1359_v35 = vadd.f32 %v1358_v63, %v2529_v11 }
 0x289   : > { %v1247_v1 = vpop.f32.mrf.mxu0  ;;  %v1360_v2 = vpop.f32.mrf.mxu1 }
 0x28a   : > { %v1248_v17 = vadd.f32 %v1247_v1, %v2529_v11  ;;  %v1631_v34 = vmax.f32 %v1246_v21, 0.0  ;;  %v1633_v53 = vmax.f32 %v1359_v35, 0.0  ;;  %v1361_v57 = vadd.f32 %v1360_v2, %v2529_v11 }
 0x28b   : > { %v1251_v3 = vpop.f32.mrf.mxu0  ;;  %v1364_v4 = vpop.f32.mrf.mxu1 }
 0x28c   : > { %v1632_v27 = vmax.f32 %v1248_v17, 0.0  ;;  %v1252_v28 = vadd.f32 %v1251_v3, %v2531_v13  ;;  %v1365_v47 = vadd.f32 %v1364_v4, %v2531_v13 }
 0x28d   : > { %v1253_v5 = vpop.f32.mrf.mxu0  ;;  %v1366_v6 = vpop.f32.mrf.mxu1 }
 0x28e   : > { %v1254_v22 = vadd.f32 %v1253_v5, %v2531_v13  ;;  %v1711_v43 = vmax.f32 %v1631_v34, %v1632_v27  ;;  %v1639_v30 = vmax.f32 %v1252_v28, 0.0  ;;  %v1641_v60 = vmax.f32 %v1365_v47, 0.0 }
 0x28f   : > { %v1257_v7 = vpop.f32.mrf.mxu0  ;;  %v1370_v8 = vpop.f32.mrf.mxu1  ;;  %v1367_v61 = vadd.f32 %v1366_v6, %v2531_v13 }
 0x290   : > { %v1258_v31 = vadd.f32 %v1257_v7, %v2533_v16  ;;  %v1640_v36 = vmax.f32 %v1254_v22, 0.0  ;;  %v1371_v50 = vadd.f32 %v1370_v8, %v2533_v16  ;;  %v1719_v46 = vmax.f32 %v1711_v43, %v1633_v53  ;;  %v2565_v7 = vpop.permute.xlu1 %1141 }
 0x291   : > { %v1259_v9 = vpop.f32.mrf.mxu0  ;;  %v1372_v10 = vpop.f32.mrf.mxu1 }
 0x292   : > { %v1260_v23 = vadd.f32 %v1259_v9, %v2533_v16  ;;  %v1647_v49 = vmax.f32 %v1258_v31, 0.0  ;;  %v1712_v54 = vmax.f32 %v1639_v30, %v1640_v36  ;;  %v1649_v63 = vmax.f32 %v1371_v50, 0.0  ;;  %v2580_v30 = vpop.permute.xlu0 %1146 }
 0x293   : > { %v1373_v1 = vadd.f32 %v1372_v10, %v2533_v16  ;;  %v1642_v10 = vmax.f32 %v1367_v61, 0.0 }
 0x294   : > { %v1648_v39 = vmax.f32 %v1260_v23, 0.0  ;;  %v1720_v8 = vmax.f32 %v1712_v54, %v1641_v60 }
 0x295   : > { %v1263_v12 = vpop.f32.mrf.mxu0  ;;  %v1376_v0 = vpop.f32.mrf.mxu1  ;;  %v1650_v23 = vmax.f32 %v1373_v1, 0.0 }
 0x296   : > { %v1264_v38 = vadd.f32 %v1263_v12, %v2536_v20  ;;  %v1377_v56 = vadd.f32 %v1376_v0, %v2536_v20  ;;  %v1713_v58 = vmax.f32 %v1647_v49, %v1648_v39  ;;  %v1634_v0 = vmax.f32 %v1361_v57, 0.0 }
 0x297   : > { %v1265_v14 = vpop.f32.mrf.mxu0  ;;  %v1378_v15 = vpop.f32.mrf.mxu1  ;;  %v1728_v31 = vmax.f32 %v1720_v8, %v1642_v10 }
 0x298   : > { %v1266_v29 = vadd.f32 %v1265_v14, %v2536_v20  ;;  %v1655_v55 = vmax.f32 %v1264_v38, 0.0  ;;  %v1657_v9 = vmax.f32 %v1377_v56, 0.0  ;;  %v1379_v12 = vadd.f32 %v1378_v15, %v2536_v20 }
 0x299   : > { %v1721_v14 = vmax.f32 %v1713_v58, %v1649_v63  ;;  %v1727_v22 = vmax.f32 %v1719_v46, %v1634_v0 }
 0x29a   : > { %v1656_v48 = vmax.f32 %v1266_v29, 0.0  ;;  %v1658_v15 = vmax.f32 %v1379_v12, 0.0 }
 0x29b   : > { %v1269_v18 = vpop.f32.mrf.mxu0  ;;  %v1382_v19 = vpop.f32.mrf.mxu1  ;;  %v1729_v36 = vmax.f32 %v1721_v14, %v1650_v23 }
 0x29c   : > { %v1270_v51 = vadd.f32 %v1269_v18, %v2544_v33  ;;  %v1714_v62 = vmax.f32 %v1655_v55, %v1656_v48  ;;  %v1383_v4 = vadd.f32 %v1382_v19, %v2544_v33 }
 0x29d   : > { %v1271_v24 = vpop.f32.mrf.mxu0  ;;  %v1384_v26 = vpop.f32.mrf.mxu1 }
 0x29e   : > { %v1272_v40 = vadd.f32 %v1271_v24, %v2544_v33  ;;  %v1663_v3 = vmax.f32 %v1270_v51, 0.0  ;;  %v1722_v21 = vmax.f32 %v1714_v62, %v1657_v9  ;;  %v1665_v24 = vmax.f32 %v1383_v4, 0.0 }
 0x29f   : > { %v1275_v32 = vpop.f32.mrf.mxu0  ;;  %v1388_v25 = vpop.f32.mrf.mxu1  ;;  %v1385_v27 = vadd.f32 %v1384_v26, %v2544_v33 }
 0x2a0   : > { %v1664_v44 = vmax.f32 %v1272_v40, 0.0  ;;  %v1276_v34 = vadd.f32 %v1275_v32, %v2565_v7  ;;  %v1389_v39 = vadd.f32 %v1388_v25, %v2565_v7  ;;  %v2582_v26 = vmax.f32 %v1722_v21, %v1658_v15 }
 0x2a1   : > { %v1277_v41 = vpop.f32.mrf.mxu0  ;;  %v1390_v42 = vpop.f32.mrf.mxu1  ;;  %v1666_v32 = vmax.f32 %v1385_v27, 0.0 }
 0x2a2   : > { %v1715_v6 = vmax.f32 %v1663_v3, %v1664_v44  ;;  %v1278_v19 = vadd.f32 %v1277_v41, %v2565_v7  ;;  %v2578_v40 = vadd.f32 %v1390_v42, %v2565_v7  ;;  %v1671_v54 = vmax.f32 %v1276_v34, 0.0 }
 0x2a3   : > { %v1281_v37 = vpop.f32.mrf.mxu0  ;;  %v1394_v52 = vpop.f32.mrf.mxu1  ;;  %v1673_v44 = vmax.f32 %v1389_v39, 0.0 }
 0x2a4   : > { %v1723_v38 = vmax.f32 %v1715_v6, %v1665_v24  ;;  %v1672_v47 = vmax.f32 %v1278_v19, 0.0  ;;  %v2586_v50 = vadd.f32 %v1281_v37, %v2580_v30  ;;  %v2589_v51 = vadd.f32 %v1394_v52, %v2580_v30 }
 0x2a5   : > { %v2554_v59 = vpop.f32.mrf.mxu0  ;;  %v2556_v45 = vpop.f32.mrf.mxu1  ;;  %v1674_v46 = vmax.f32 %v2578_v40, 0.0 }
 0x2a6   : > { %v2593_v58 = vmax.f32 %v1723_v38, %v1666_v32  ;;  %v1716_v52 = vmax.f32 %v1671_v54, %v1672_v47  ;;  %v1679_v3 = vmax.f32 %v2586_v50, 0.0  ;;  %v1681_v4 = vmax.f32 %v2589_v51, 0.0 }
 0x2a7   : > { %v2561_v5 = vpop.f32.mrf.mxu0  ;;  %v2563_v2 = vpop.f32.mrf.mxu1  ;;  %v1284_v14 = vadd.f32 %v2554_v59, %v2580_v30  ;;  %v2606_v21 = vadd.f32 %v2556_v45, %v2580_v30 }
 0x2a9   : > { %v2568_v17 = vpop.f32.mrf.mxu0  ;;  %v2570_v18 = vpop.f32.mrf.mxu1 }
 0x2ab   : > { %v1471_v28 = vpop.f32.mrf.mxu0  ;;  %v1584_v29 = vpop.f32.mrf.mxu1 }
 0x2ac   : > { %v1472_v35 = vadd.f32 %v1471_v28, %v2529_v11  ;;  %v1585_v25 = vadd.f32 %v1584_v29, %v2529_v11  ;;  %v2609_v28 = vpop.permute.xlu1 %1151  ;;  %v1724_v29 = vmax.f32 %v1716_v52, %v1673_v44 }
 0x2ad   : > { %v1473_v41 = vpop.f32.mrf.mxu0  ;;  %v1586_v43 = vpop.f32.mrf.mxu1 }
 0x2ae   : > { %v1635_v48 = vmax.f32 %v1472_v35, 0.0  ;;  %v1474_v49 = vadd.f32 %v1473_v41, %v2529_v11  ;;  %v1587_v37 = vadd.f32 %v1586_v43, %v2529_v11  ;;  %v1637_v8 = vmax.f32 %v1585_v25, 0.0 }
 0x2af   : > { %v1477_v42 = vpop.f32.mrf.mxu0  ;;  %v1590_v53 = vpop.f32.mrf.mxu1 }
 0x2b0   : > { %v1735_v55 = vmax.f32 %v1727_v22, %v1635_v48  ;;  %v1636_v56 = vmax.f32 %v1474_v49, 0.0  ;;  %v1478_v57 = vadd.f32 %v1477_v42, %v2531_v13  ;;  %v1591_v9 = vadd.f32 %v1590_v53, %v2531_v13 }
 0x2b1   : > { %v1479_v60 = vpop.f32.mrf.mxu0  ;;  %v1592_v61 = vpop.f32.mrf.mxu1  ;;  %v1638_v19 = vmax.f32 %v1587_v37, 0.0  ;;  %v1401_v49 = vadd.f32 %v2563_v2, %v2609_v28  ;;  %v1680_v53 = vmax.f32 %v1284_v14, 0.0 }
 0x2b2   : > { %v1743_v62 = vmax.f32 %v1735_v55, %v1636_v56  ;;  %v1643_v63 = vmax.f32 %v1478_v57, 0.0  ;;  %v1480_v1 = vadd.f32 %v1479_v60, %v2531_v13  ;;  %v1593_v22 = vadd.f32 %v1592_v61, %v2531_v13 }
 0x2b3   : > { %v1483_v12 = vpop.f32.mrf.mxu0  ;;  %v1596_v0 = vpop.f32.mrf.mxu1  ;;  %v1645_v35 = vmax.f32 %v1591_v9, 0.0  ;;  %v1290_v13 = vadd.f32 %v2568_v17, %v2609_v28  ;;  %v1682_v17 = vmax.f32 %v2606_v21, 0.0 }
 0x2b4   : > { %v1736_v11 = vmax.f32 %v1728_v31, %v1643_v63  ;;  %v1644_v6 = vmax.f32 %v1480_v1, 0.0  ;;  %v1484_v10 = vadd.f32 %v1483_v12, %v2533_v16  ;;  %v1751_v27 = vmax.f32 %v1743_v62, %v1637_v8 }
 0x2b5   : > { %v1485_v23 = vpop.f32.mrf.mxu0  ;;  %v1598_v24 = vpop.f32.mrf.mxu1  ;;  %v1288_v31 = vadd.f32 %v2561_v5, %v2609_v28  ;;  %v1597_v45 = vadd.f32 %v1596_v0, %v2533_v16  ;;  %v1646_v32 = vmax.f32 %v1593_v22, 0.0  ;;  %v1688_v60 = vmax.f32 %v1290_v13, 0.0 }
 0x2b6   : > { %v1744_v15 = vmax.f32 %v1736_v11, %v1644_v6  ;;  %v1651_v34 = vmax.f32 %v1484_v10, 0.0  ;;  %v1486_v59 = vadd.f32 %v1485_v23, %v2533_v16  ;;  %v1759_v41 = vmax.f32 %v1751_v27, %v1638_v19 }
 0x2b7   : > { %v1489_v38 = vpop.f32.mrf.mxu0  ;;  %v1602_v39 = vpop.f32.mrf.mxu1  ;;  %v1599_v50 = vadd.f32 %v1598_v24, %v2533_v16  ;;  %v1687_v62 = vmax.f32 %v1288_v31, 0.0  ;;  %v1717_v0 = vmax.f32 %v1679_v3, %v1680_v53  ;;  %v1732_v10 = vmax.f32 %v1724_v29, %v1674_v46 }
 0x2b8   : > { %v1737_v43 = vmax.f32 %v1729_v36, %v1651_v34  ;;  %v1652_v47 = vmax.f32 %v1486_v59, 0.0  ;;  %v1490_v48 = vadd.f32 %v1489_v38, %v2536_v20  ;;  %1786 = vmax.xlane.f32.xlu0 %v1759_v41  ;;  %v1752_v42 = vmax.f32 %v1744_v15, %v1645_v35 }
 0x2b9   : > { %v1491_v5 = vpop.f32.mrf.mxu0  ;;  %v1604_v25 = vpop.f32.mrf.mxu1  ;;  %v1653_v36 = vmax.f32 %v1597_v45, 0.0  ;;  %v1603_v57 = vadd.f32 %v1602_v39, %v2536_v20  ;;  %v1654_v63 = vmax.f32 %v1599_v50, 0.0  ;;  %v1718_v24 = vmax.f32 %v1687_v62, %v1688_v60 }
 0x2ba   : > { %v1745_v54 = vmax.f32 %v1737_v43, %v1652_v47  ;;  %v1659_v55 = vmax.f32 %v1490_v48, 0.0  ;;  %v1492_v56 = vadd.f32 %v1491_v5, %v2536_v20  ;;  %v1760_v2 = vmax.f32 %v1752_v42, %v1646_v32 }
 0x2bb   : > { %v1495_v44 = vpop.f32.mrf.mxu0  ;;  %v1608_v37 = vpop.f32.mrf.mxu1  ;;  %v1605_v1 = vadd.f32 %v1604_v25, %v2536_v20  ;;  %v1689_v3 = vmax.f32 %v1401_v49, 0.0  ;;  %v1725_v29 = vmax.f32 %v1717_v0, %v1681_v4 }
 0x2bc   : > { %v1738_v16 = vmax.f32 %v2582_v26, %v1659_v55  ;;  %v1660_v61 = vmax.f32 %v1492_v56, 0.0  ;;  %v1496_v52 = vadd.f32 %v1495_v44, %v2544_v33  ;;  %1788 = vmax.xlane.f32.xlu1 %v1760_v2  ;;  %v1753_v12 = vmax.f32 %v1745_v54, %v1653_v36 }
 0x2bd   : > { %v1497_v8 = vpop.f32.mrf.mxu0  ;;  %v1610_v9 = vpop.f32.mrf.mxu1  ;;  %v1661_v26 = vmax.f32 %v1603_v57, 0.0  ;;  %v1609_v21 = vadd.f32 %v1608_v37, %v2544_v33  ;;  %v1662_v34 = vmax.f32 %v1605_v1, 0.0  ;;  %v1726_v47 = vmax.f32 %v1718_v24, %v1689_v3 }
 0x2be   : > { %v1746_v14 = vmax.f32 %v1738_v16, %v1660_v61  ;;  %v1667_v11 = vmax.f32 %v1496_v52, 0.0  ;;  %v1498_v6 = vadd.f32 %v1497_v8, %v2544_v33  ;;  %v1761_v23 = vmax.f32 %v1753_v12, %v1654_v63 }
 0x2bf   : > { %v1501_v19 = vpop.f32.mrf.mxu0  ;;  %v1614_v22 = vpop.f32.mrf.mxu1  ;;  %v1611_v59 = vadd.f32 %v1610_v9, %v2544_v33  ;;  %v1669_v39 = vmax.f32 %v1609_v21, 0.0  ;;  %v1733_v42 = vmax.f32 %v1725_v29, %v1682_v17 }
 0x2c0   : > { %v1739_v20 = vmax.f32 %v2593_v58, %v1667_v11  ;;  %v1668_v27 = vmax.f32 %v1498_v6, 0.0  ;;  %v1502_v15 = vadd.f32 %v1501_v19, %v2565_v7  ;;  %1790 = vmax.xlane.f32.xlu0 %v1761_v23  ;;  %v1754_v46 = vmax.f32 %v1746_v14, %v1661_v26 }
 0x2c1   : > { %v1503_v31 = vpop.f32.mrf.mxu0  ;;  %v1616_v40 = vpop.f32.mrf.mxu1  ;;  %v1403_v58 = vadd.f32 %v2570_v18, %v2609_v28  ;;  %v1615_v41 = vadd.f32 %v1614_v22, %v2565_v7  ;;  %v1670_v51 = vmax.f32 %v1611_v59, 0.0 }
 0x2c2   : > { %v1747_v35 = vmax.f32 %v1739_v20, %v1668_v27  ;;  %v1675_v45 = vmax.f32 %v1502_v15, 0.0  ;;  %v1504_v38 = vadd.f32 %v1503_v31, %v2565_v7  ;;  %v1762_v33 = vmax.f32 %v1754_v46, %v1662_v34 }
 0x2c3   : > { %v1507_v13 = vpop.f32.mrf.mxu0  ;;  %v1620_v43 = vpop.f32.mrf.mxu1  ;;  %v1617_v4 = vadd.f32 %v1616_v40, %v2565_v7  ;;  %v1690_v56 = vmax.f32 %v1403_v58, 0.0  ;;  %v1677_v36 = vmax.f32 %v1615_v41, 0.0  ;;  %v1810_v27 = vlaneseq }
 0x2c4   : > { %v1740_v48 = vmax.f32 %v1732_v10, %v1675_v45  ;;  %v1676_v49 = vmax.f32 %v1504_v38, 0.0  ;;  %v1508_v32 = vadd.f32 %v1507_v13, %v2580_v30  ;;  %v1621_v50 = vadd.f32 %v1620_v43, %v2580_v30  ;;  %1792 = vmax.xlane.f32.xlu0 %v1762_v33 }
 0x2c5   : > { %v1509_v5 = vpop.f32.mrf.mxu0  ;;  %v1622_v25 = vpop.f32.mrf.mxu1  ;;  %v1755_v18 = vmax.f32 %v1747_v35, %v1669_v39  ;;  %v1734_v61 = vmax.f32 %v1726_v47, %v1690_v56  ;;  %v1678_v52 = vmax.f32 %v1617_v4, 0.0  ;;  %v1811_v3 = vand.u32 127, %v1810_v27 }
 0x2c6   : > { %v1748_v53 = vmax.f32 %v1740_v48, %v1676_v49  ;;  %v1683_v54 = vmax.f32 %v1508_v32, 0.0  ;;  %v1510_v55 = vadd.f32 %v1509_v5, %v2580_v30  ;;  %v1623_v57 = vadd.f32 %v1622_v25, %v2580_v30 }
 0x2c7   : > { %v1513_v44 = vpop.f32.mrf.mxu0  ;;  %v1626_v37 = vpop.f32.mrf.mxu1  ;;  %v1763_v2 = vmax.f32 %v1755_v18, %v1670_v51  ;;  %v1685_v62 = vmax.f32 %v1621_v50, 0.0  ;;  %v1816_v59 = vadd.s32 4294967288, %v1811_v3  ;;  %v1823_v31 = vadd.s32 4294967280, %v1811_v3 }
 0x2c8   : > { %v1741_v60 = vmax.f32 %v1733_v42, %v1683_v54  ;;  %v1684_v7 = vmax.f32 %v1510_v55, 0.0  ;;  %v1514_v16 = vadd.f32 %v1513_v44, %v2609_v28  ;;  %v1756_v1 = vmax.f32 %v1748_v53, %v1677_v36 }
 0x2c9   : > { %1794 = vmax.xlane.f32.xlu1 %v1763_v2  ;;  %v1515_v17 = vpop.f32.mrf.mxu0  ;;  %v1628_v63 = vpop.f32.mrf.mxu1  ;;  %v1627_v12 = vadd.f32 %v1626_v37, %v2609_v28  ;;  %v1686_v0 = vmax.f32 %v1623_v57, 0.0  ;;  %v1813_v40 = vshrl.u32 %v1810_v27, 7  ;;  %v1830_v46 = vadd.s32 4294967272, %v1811_v3 }
 0x2ca   : > { %v1749_v8 = vmax.f32 %v1741_v60, %v1684_v7  ;;  %v1691_v9 = vmax.f32 %v1514_v16, 0.0  ;;  %v1516_v30 = vadd.f32 %v1515_v17, %v2609_v28  ;;  %v1764_v14 = vmax.f32 %v1756_v1, %v1678_v52 }
 0x2cb   : > { %v1629_v10 = vadd.f32 %v1628_v63, %v2609_v28  ;;  %v1693_v21 = vmax.f32 %v1627_v12, 0.0  ;;  %v1837_v29 = vadd.s32 4294967264, %v1811_v3  ;;  %v1819_v35 = vsub.s32 %v1816_v59, %v1813_v40 }
 0x2cc   : > { %v1742_v11 = vmax.f32 %v1734_v61, %v1691_v9  ;;  %v1692_v6 = vmax.f32 %v1516_v30, 0.0  ;;  %v1757_v26 = vmax.f32 %v1749_v8, %v1685_v62  ;;  %1796 = vmax.xlane.f32.xlu0 %v1764_v14  ;;  %v1844_v45 = vadd.s32 4294967256, %v1811_v3 }
 0x2cd   : > { %v1694_v23 = vmax.f32 %v1629_v10, 0.0  ;;  %v1826_v38 = vsub.s32 %v1823_v31, %v1813_v40  ;;  %v1851_v39 = vadd.s32 4294967248, %v1811_v3  ;;  %v1814_v41 = vsub.s32 %v1811_v3, %v1813_v40 }
 0x2ce   : > { %v1750_v19 = vmax.f32 %v1742_v11, %v1692_v6  ;;  %v1765_v22 = vmax.f32 %v1757_v26, %v1686_v0  ;;  %v1833_v13 = vsub.s32 %v1830_v46, %v1813_v40  ;;  %v1840_v43 = vsub.s32 %v1837_v29, %v1813_v40 }
 0x2cf   : > { %v1847_v48 = vsub.s32 %v1844_v45, %v1813_v40  ;;  %v1858_v49 = vadd.s32 4294967240, %v1811_v3  ;;  %v1854_v4 = vsub.s32 %v1851_v39, %v1813_v40 }
 0x2d0   : > { %1798 = vmax.xlane.f32.xlu1 %v1765_v22  ;;  %v1758_v24 = vmax.f32 %v1750_v19, %v1693_v21 }
 0x2d1   : > { %v1861_v54 = vsub.s32 %v1858_v49, %v1813_v40 }
 0x2d2   : > { %v1766_v20 = vmax.f32 %v1758_v24, %v1694_v23 }
 0x2d4   : > { %1800 = vmax.xlane.f32.xlu0 %v1766_v20 }
 0x341   : > { %v1787_v15 = vpop.xlane.xlu0 %1786 }
 0x342   : > { %v1815_v50 = vrot.slane %v1787_v15, %v1814_v41 }
 0x345   : > { %v1789_v28 = vpop.xlane.xlu1 %1788 }
 0x346   : > { %v1820_v47 = vrot.slane %v1789_v28, %v1819_v35 }
 0x348   : > { %v1822_v42 = vsel %vm1821_vm3, %v1820_v47, %v1815_v50 }
 0x349   : > { %v1791_v34 = vpop.xlane.xlu0 %1790 }
 0x34a   : > { %v1827_v32 = vrot.slane %v1791_v34, %v1826_v38 }
 0x34c   : > { %v1829_v55 = vsel %vm1828_vm4, %v1827_v32, %v1822_v42 }
 0x34d   : > { %v1793_v58 = vpop.xlane.xlu0 %1792 }
 0x34e   : > { %v1834_v5 = vrot.slane %v1793_v58, %v1833_v13 }
 0x350   : > { %v1836_v36 = vsel %vm1835_vm5, %v1834_v5, %v1829_v55 }
 0x352   : > { %v1795_v33 = vpop.xlane.xlu1 %1794 }
 0x353   : > { %v1841_v25 = vrot.slane %v1795_v33, %v1840_v43 }
 0x355   : > { %v1797_v51 = vpop.xlane.xlu0 %1796  ;;  %v1843_v57 = vsel %vm1842_vm6, %v1841_v25, %v1836_v36 }
 0x356   : > { %v1848_v53 = vrot.slane %v1797_v51, %v1847_v48 }
 0x358   : > { %v1850_v37 = vsel %vm1849_vm7, %v1848_v53, %v1843_v57 }
 0x359   : > { %v1799_v18 = vpop.xlane.xlu1 %1798 }
 0x35a   : > { %v1855_v56 = vrot.slane %v1799_v18, %v1854_v4 }
 0x35c   : > { %v1857_v60 = vsel %vm1856_vm8, %v1855_v56, %v1850_v37 }
 0x35d   : > { %v1801_v44 = vpop.xlane.xlu0 %1800 }
 0x35e   : > { %v1862_v2 = vrot.slane %v1801_v44, %v1861_v54 }
 0x360   : > { %v1864_v7 = vsel %vm1863_vm9, %v1862_v2, %v1857_v60 }
 0x361   : > { %1867 = vst.msk [vmem:[%s293_s10] sm:$0x1] %vm1866_vm10, %v1864_v7 }
 0x362   : > { %2089 = shalt.err (!%p2086_p5)
}
 0x363   : > { %s2090_s22 = scalar_lea.hbm %s2656_s17, 16  ;;  %s2094_s8 = scalar_lea.hbm %s2705_s7, 32 }
 0x364   : > { %p2091_p6 = scmp.ne.s32.totalorder %s2656_s17, %s2090_s22  ;;  %p2095_p10 = scmp.lt.s32.totalorder %s2656_s17, %s2705_s7 }
 0x365   : > { %p2096_p11 = scmp.lt.s32.totalorder %s2094_s8, %s2090_s22 }
 0x366   : > { %p2092_p7 = pnand %p2091_p6, %p2237_p4 }
 0x367   : > { %p2097_p12 = por %p2096_p11, %p2095_p10 }
 0x368   : > { %p2093_p9 = pneg %p2092_p7 }
 0x36a   : > { %p2098_p13 = pnand %p2097_p12, %p2093_p9 }
 0x36c   : > { %2101 = shalt.err (!%p2098_p13)
}
 0x36d   : > { %2017 = dma.vmem_to_hbm [thread:$0]  (%p2237_p4), %s1882_s12, 16, %s2656_s17, %s1869_s27  }
 0x36e PF: > { %p2023_p0 = scmp.ge.s32.totalorder %s2152_s29, 2  ;;  %s1893_s16 = sand.u32 1, %s2132_s24  }
 0x36f   : > { %s1894_s18 = scalar_lea.sflag [#allocation4], %s1893_s16 }
 0x370   : > { %p2020_p1 = pnand %p2023_p0, %p2244_p8 }
 0x372   : > { %p2021_p2 = pneg %p2020_p1 }
 0x374   : > { %2127 = dma.done.wait (%p2021_p2), %s1894_s18, 16  }
 0x375   : > { %2129 = vsyncadd (%p2021_p2), %s1894_s18, 4294967280  ;;  %s20_s29 = sadd.s32 1, %s2152_s29   ;;  %s2708_s24 = smov %s2136_s25 }
 0x376   : > { %p17_p3 = scmp.ge.s32.totalorder %s20_s29, 4   ;;  %s2709_s25 = smov %s2140_s26 }
 0x377   : > { %s2710_s26 = smov %s2250_s14  ;;  %s2711_s27 = smov %s2148_s28 }
 0x378   : > { %s2712_s28 = smov %s2714_s9  ;;  %19 = sbr.rel (!%p17_p3) target bundleno = 4 (0x4), region = 91 }
 0x37d   :  { %1898 = vsyncpa [#allocation4], 1 }
 0x37e   :  { %1900 = vsyncpa [#allocation4 + $0x1], 1 }

</bundles_post_ra>
